<compile_context>
chip_gen: v5e
topology: v5e:2x2
jax: 0.10.0
libtpu: 0.0.40
codegen_flags: <defaults>
</compile_context>

<pallas_src>
import functools
from types import SimpleNamespace

import jax
import jax.numpy as jnp
from jax import lax
from jax.experimental import pallas as pl
from jax.experimental.pallas import tpu as pltpu


_LANE = 128
_SUBLANE = 8
_VMEM_BUDGET_BYTES = 40 * 1024 * 1024    # block_b sizing budget (fits v7x's 64 MiB VMEM)
_VMEM_LIMIT_BYTES = 48 * 1024 * 1024     # scoped-VMEM limit handed to Mosaic


def _round_up(x, m):
    return ((x + m - 1) // m) * m


def _default_m_dtype():
    # bf16 m-scratch halves VMEM + vld traffic on bf16-VPU chips (v6e / v7x);
    # keep f32 on v5-and-older (no bf16 VALU -> unpack/convert overhead).
    try:
        kind = jax.devices()[0].device_kind.lower()
        if any(v in kind for v in ('v2', 'v3', 'v4', 'v5')):
            return jnp.float32
    except Exception:
        pass
    return jnp.bfloat16


# --------------------------------------------------------------------------------------
# Kernel
# --------------------------------------------------------------------------------------
def _set2vec_kernel(h_vs_ref, wm_ref, bm_ref, wqh_ref, wr_ref, bg_ref,
                    woq_ref, wor_ref, bout_ref, out_ref, m_ref, *, n_steps, n_real):
    blk_b, Np, Dp = h_vs_ref.shape
    Hp = wm_ref.shape[1]

    # ---- Node-memory projection: one lane-dense (blk_b*Np, Dp)@(Dp, Hp) bf16 MXU matmul
    #      with f32 accumulation; result parked in VMEM scratch so it is not a live vreg
    #      value across the unrolled set2set loop.  (h_vs arrives pre-cast to bf16.)
    hv = h_vs_ref[...].reshape(blk_b * Np, Dp)
    m2 = jnp.dot(hv, wm_ref[...], preferred_element_type=jnp.float32) + bm_ref[...]
    m_ref[...] = m2.reshape(blk_b, Np, Hp).astype(m_ref.dtype)

    h = jnp.zeros((blk_b, Hp), jnp.float32)
    c = jnp.zeros((blk_b, Hp), jnp.float32)
    r = jnp.zeros((blk_b, Hp), jnp.float32)

    # Additive mask for layout-padding rows of the node axis (exp(-1e30) == 0 -> exact).
    masked = n_real < Np
    if masked:
        node_ok = lax.broadcasted_iota(jnp.int32, (blk_b, Np, 1), 1) < n_real

    def _sigmoid(x):
        # Saturating tanh form: one EUP op, no exp overflow / NaN risk, exact sigmoid.
        return 0.5 * (jnp.tanh(0.5 * x) + 1.0)

    for _ in range(n_steps):
        # LSTM cell, PyTorch gate order (i, f, g, o).  In set2set the q-half of the LSTM
        # input always equals the running hidden state h, so W_hh is folded into the
        # q-half weights on the host (W_qh = W_ih_q + W_hh) and the 4 gates are packed
        # along the lane axis: 2 wide bf16 MXU matmuls per step.  Gate math stays f32.
        pre = (jnp.dot(h.astype(jnp.bfloat16), wqh_ref[...],
                       preferred_element_type=jnp.float32)
               + jnp.dot(r.astype(jnp.bfloat16), wr_ref[...],
                         preferred_element_type=jnp.float32)
               + bg_ref[...])                                        # (blk_b, 4*Hp)
        i_g = _sigmoid(pre[:, 0 * Hp:1 * Hp])
        f_g = _sigmoid(pre[:, 1 * Hp:2 * Hp])
        g_g = jnp.tanh(pre[:, 2 * Hp:3 * Hp])
        o_g = _sigmoid(pre[:, 3 * Hp:4 * Hp])
        c = f_g * c + i_g * g_g
        h = o_g * jnp.tanh(c)                                        # (blk_b, Hp) f32

        # Attention over the node set: VPU multiply + XLU reduce, H kept on lanes and N
        # on sublanes throughout (no lane<->sublane relayout of the softmax weights).
        m = m_ref[...].astype(jnp.float32)                           # (blk_b, Np, Hp)
        e = jnp.sum(m * h[:, None, :], axis=-1, keepdims=True)       # (blk_b, Np, 1)
        if masked:
            e = jnp.where(node_ok, e, jnp.float32(-1e30))
        e = e - jnp.max(e, axis=1, keepdims=True)
        p = jnp.exp(e)
        inv = pl.reciprocal(jnp.sum(p, axis=1, keepdims=True), approx=True)
        a = p * inv                                                  # softmax over nodes
        r = jnp.sum(a * m, axis=1)                                   # (blk_b, Hp)

    # Final linear on [h ; r] as two summed bf16 matmuls (no concat), into a
    # 128-lane-padded slab for an unmasked lane-dense store.
    out = (jnp.dot(h.astype(jnp.bfloat16), woq_ref[...], preferred_element_type=jnp.float32)
           + jnp.dot(r.astype(jnp.bfloat16), wor_ref[...], preferred_element_type=jnp.float32)
           + bout_ref[...])
    out_ref[...] = out.astype(out_ref.dtype)


# --------------------------------------------------------------------------------------
# Wrapper
# --------------------------------------------------------------------------------------
def _choose_block_b(B, Np, Dp, Hp, Rp, m_itemsize):
    if B <= _SUBLANE:
        return B
    # Bytes that scale with block_b: bf16 input tile (double-buffered), m scratch,
    # f32 output tile (double-buffered).
    per_row = 2 * Np * Dp * 2 + Np * Hp * m_itemsize + 2 * Rp * 4
    # Constant-index weight blocks (default double-buffered): bf16 matrices + f32 biases.
    w_bytes = 2 * ((Dp * Hp + 2 * Hp * 4 * Hp + 2 * Hp * Rp) * 2
                   + (Hp + 4 * Hp + Rp) * 4)
    avail = _VMEM_BUDGET_BYTES - w_bytes
    cap = max(_SUBLANE, min(512, (avail // per_row) // _SUBLANE * _SUBLANE))
    # Aim for >= 2 balanced grid steps so v7x's 2 TensorCores both get work and the h_vs
    # DMA pipelines under the previous block's set2set loop; avoid a tiny tail block.
    n_blocks = max(2, pl.cdiv(B, min(cap, 64)))
    bb = _round_up(pl.cdiv(B, n_blocks), _SUBLANE)
    return int(min(bb, cap))


def set2vec_pallas(h_vs, kp, *, n_steps=3, block_b=None, m_dtype=None):
    B, N, D = h_vs.shape
    Dp, Hp = kp['W_m'].shape
    Rp = kp['W_out_q'].shape[1]
    Np = _round_up(N, _SUBLANE)

    if m_dtype is None:
        m_dtype = _default_m_dtype()

    # Ship the only large streaming input as bf16 and zero-pad N (sublane multiple) and D
    # (to the weight's padded width).  All padding is exact (zeros / masked in softmax).
    hv = h_vs.astype(jnp.bfloat16)
    if Np != N or Dp != D:
        hv = jnp.pad(hv, ((0, 0), (0, Np - N), (0, Dp - D)))

    if block_b is None:
        block_b = _choose_block_b(B, Np, Dp, Hp, Rp, jnp.dtype(m_dtype).itemsize)
    grid = (pl.cdiv(B, block_b),)

    c2 = lambda b: (0, 0)
    in_specs = [
        pl.BlockSpec((block_b, Np, Dp), lambda b: (b, 0, 0)),   # h_vs tile (bf16, pipelined)
        pl.BlockSpec((Dp, Hp), c2),                             # W_m            (bf16)
        pl.BlockSpec((1, Hp), c2),                              # b_m            (f32)
        pl.BlockSpec((Hp, 4 * Hp), c2),                         # W_qh packed    (bf16)
        pl.BlockSpec((Hp, 4 * Hp), c2),                         # W_r  packed    (bf16)
        pl.BlockSpec((1, 4 * Hp), c2),                          # folded gate bias (f32)
        pl.BlockSpec((Hp, Rp), c2),                             # W_out q-half   (bf16)
        pl.BlockSpec((Hp, Rp), c2),                             # W_out r-half   (bf16)
        pl.BlockSpec((1, Rp), c2),                              # b_out (f32, lane-padded)
    ]
    out_spec = pl.BlockSpec((block_b, Rp), lambda b: (b, 0))

    args = (hv, kp['W_m'], kp['b_m'], kp['W_qh'], kp['W_r'], kp['b_g'],
            kp['W_out_q'], kp['W_out_r'], kp['b_out'])

    weight_bytes = sum(int(a.size) * a.dtype.itemsize for a in args[1:])
    flops = (2 * B * Np * Dp * Hp                              # memory projection
             + n_steps * (2 * 2 * B * Hp * 4 * Hp              # 2 packed gate matmuls
                          + 4 * B * Np * Hp)                   # attention mul/reduce
             + 2 * 2 * B * Hp * Rp)                            # output linear
    cost = pl.CostEstimate(
        flops=int(flops),
        transcendentals=int(n_steps * B * (5 * Hp + Np + 1)),
        bytes_accessed=int(hv.size * hv.dtype.itemsize + weight_bytes + B * Rp * 4),
    )

    return pl.pallas_call(
        functools.partial(_set2vec_kernel, n_steps=n_steps, n_real=N),
        out_shape=jax.ShapeDtypeStruct((B, Rp), jnp.float32),
        grid_spec=pltpu.PrefetchScalarGridSpec(
            num_scalar_prefetch=0,
            grid=grid,
            in_specs=in_specs,
            out_specs=out_spec,
            scratch_shapes=[pltpu.VMEM((block_b, Np, Hp), m_dtype)],
        ),
        compiler_params=pltpu.CompilerParams(
            dimension_semantics=("parallel",),          # shards batch tiles across v7x's 2 TCs
            vmem_limit_bytes=_VMEM_LIMIT_BYTES),
        cost_estimate=cost,
    )(*args)


# --------------------------------------------------------------------------------------
# Parameters: PyTorch-layout init + preprocessing into the kernel layout
# --------------------------------------------------------------------------------------
def init_pytorch_style_params(key, hidden_dim, readout_dim, readout_hidden_dim):
    """Random params in PyTorch layouts: Linear(D,H), LSTMCell(2H,H), Linear(2H,R)."""
    D, H, R = hidden_dim, readout_hidden_dim, readout_dim
    ks = jax.random.split(key, 8)
    s = 0.1
    return {
        'mem_w': s * jax.random.normal(ks[0], (H, D), jnp.float32),
        'mem_b': s * jax.random.normal(ks[1], (H,), jnp.float32),
        'w_ih':  s * jax.random.normal(ks[2], (4 * H, 2 * H), jnp.float32),
        'b_ih':  s * jax.random.normal(ks[3], (4 * H,), jnp.float32),
        'w_hh':  s * jax.random.normal(ks[4], (4 * H, H), jnp.float32),
        'b_hh':  s * jax.random.normal(ks[5], (4 * H,), jnp.float32),
        'out_w': s * jax.random.normal(ks[6], (R, 2 * H), jnp.float32),
        'out_b': s * jax.random.normal(ks[7], (R,), jnp.float32),
    }


def prepare_kernel_params(p):
    """Host-side preprocessing into the kernel layout:
       * transpose to x @ W form, zero-pad D/H to lane multiples and R to >= 128,
       * fold W_hh into the q-half input weights (exact: q == h in set2set),
       * pack the 4 gates along the output/lane axis -> (Hp, 4*Hp) per input half,
       * fold b_ih + b_hh into one bias, pre-cast all MXU operands to bf16."""
    H = p['w_hh'].shape[1]
    D = p['mem_w'].shape[1]
    R = p['out_w'].shape[0]
    Hp = _round_up(H, _LANE)
    Dp = _round_up(D, _LANE)
    Rp = max(_LANE, _round_up(R, _LANE))

    def pad2(x, rows, cols):
        return jnp.pad(x, ((0, rows - x.shape[0]), (0, cols - x.shape[1])))

    w_qh, w_r, b_g = [], [], []
    for k in range(4):                                       # PyTorch gate order i, f, g, o
        wq = p['w_ih'][k * H:(k + 1) * H, :H]                # (H, H) q-half
        wr = p['w_ih'][k * H:(k + 1) * H, H:]                # (H, H) r-half
        wh = p['w_hh'][k * H:(k + 1) * H, :]                 # (H, H)
        w_qh.append(pad2((wq + wh).T, Hp, Hp))               # W_hh folded into q-half
        w_r.append(pad2(wr.T, Hp, Hp))
        b_g.append(jnp.pad(p['b_ih'][k * H:(k + 1) * H] + p['b_hh'][k * H:(k + 1) * H],
                           (0, Hp - H)))

    return {
        'W_m': pad2(p['mem_w'].T, Dp, Hp).astype(jnp.bfloat16),           # (Dp, Hp)
        'b_m': jnp.pad(p['mem_b'], (0, Hp - H)).reshape(1, Hp),           # (1, Hp)  f32
        'W_qh': jnp.concatenate(w_qh, axis=1).astype(jnp.bfloat16),       # (Hp, 4*Hp)
        'W_r': jnp.concatenate(w_r, axis=1).astype(jnp.bfloat16),         # (Hp, 4*Hp)
        'b_g': jnp.concatenate(b_g).reshape(1, 4 * Hp),                   # (1, 4*Hp) f32
        'W_out_q': pad2(p['out_w'][:, :H].T, Hp, Rp).astype(jnp.bfloat16),
        'W_out_r': pad2(p['out_w'][:, H:].T, Hp, Rp).astype(jnp.bfloat16),
        'b_out': jnp.pad(p['out_b'], (0, Rp - R)).reshape(1, Rp),         # (1, Rp)  f32
    }


# --------------------------------------------------------------------------------------
# Pure-JAX f32 reference (for the in-script self-check)
# --------------------------------------------------------------------------------------
def set2vec_reference(h_vs, p, n_steps):
    B = h_vs.shape[0]
    H = p['w_hh'].shape[1]
    m = jnp.einsum('bnd,hd->bnh', h_vs, p['mem_w']) + p['mem_b']
    h = jnp.zeros((B, H), jnp.float32)
    c = jnp.zeros((B, H), jnp.float32)
    r = jnp.zeros((B, H), jnp.float32)
    for _ in range(n_steps):
        q_star = jnp.concatenate([h, r], axis=1)
        g = q_star @ p['w_ih'].T + p['b_ih'] + h @ p['w_hh'].T + p['b_hh']
        i_g = jax.nn.sigmoid(g[:, 0 * H:1 * H])
        f_g = jax.nn.sigmoid(g[:, 1 * H:2 * H])
        g_g = jnp.tanh(g[:, 2 * H:3 * H])
        o_g = jax.nn.sigmoid(g[:, 3 * H:4 * H])
        c = f_g * c + i_g * g_g
        h = o_g * jnp.tanh(c)
        e = jnp.einsum('bnh,bh->bn', m, h)
        a = jax.nn.softmax(e, axis=1)
        r = jnp.einsum('bn,bnh->bh', a, m)
    return jnp.concatenate([h, r], axis=1) @ p['out_w'].T + p['out_b']


# --------------------------------------------------------------------------------------
# SetReadout.forward
# --------------------------------------------------------------------------------------
def set_readout_forward(h_vs, kernel_params, config):
    """h_vs is the already-stacked per-node hiddens (B, N, D)."""
    classify = config.mode == 'clf'
    R = sum(t.dim for t in config.graph_targets)
    x_pad = set2vec_pallas(h_vs, kernel_params, n_steps=config.set2vec_steps)
    x = x_pad[:, :R]                       # drop lane padding used for the dense store
    if classify:
        return {t.name: x for t in config.graph_targets}
    # TODO(synk): like the reference's x[:, i], this assumes each regression target has dim == 1,
    #             and per-graph variable node counts (caller-side N padding) would need a per-row
    #             node-count input instead of the single static mask used for layout padding.
    return {t.name: x[:, i] for i, t in enumerate(config.graph_targets)}


if __name__ == "__main__":
    # Small deterministic example (regression mode, 3 scalar graph targets).
    config = SimpleNamespace(
        mode='reg',
        hidden_dim=32,
        readout_hidden_dim=32,
        set2vec_steps=3,
        graph_targets=[SimpleNamespace(name='mu', dim=1),
                       SimpleNamespace(name='alpha', dim=1),
                       SimpleNamespace(name='homo', dim=1)],
    )
    readout_dim = sum(t.dim for t in config.graph_targets)

    B, N, D = 2, 8, config.hidden_dim
    key = jax.random.PRNGKey(0)
    k_x, k_p = jax.random.split(key)
    # Equivalent of torch.stack([G.node[v]['hidden'] for v in G.nodes()], 1)
    h_vs = jax.random.normal(k_x, (B, N, D), jnp.float32)

    torch_style = init_pytorch_style_params(k_p, config.hidden_dim, readout_dim,
                                            config.readout_hidden_dim)
    kernel_params = prepare_kernel_params(torch_style)

    out = set_readout_forward(h_vs, kernel_params, config)
    out = jax.tree_util.tree_map(jax.block_until_ready, out)

    assert set(out.keys()) == {'mu', 'alpha', 'homo'}
    for v in out.values():
        assert v.shape == (B,)
        assert bool(jnp.all(jnp.isfinite(v)))

    # Loose-tolerance check vs. the f32 reference (bf16 MXU operands + approx reciprocal).
    ref = set2vec_reference(h_vs, torch_style, config.set2vec_steps)
    got = jnp.stack([out[t.name] for t in config.graph_targets], axis=1)
    err = float(jnp.max(jnp.abs(got - ref[:, :readout_dim])))
    assert bool(jnp.allclose(got, ref[:, :readout_dim], rtol=5e-2, atol=5e-2)), f"max|err|={err}"

    print("KERNEL_OK")
</pallas_src>

<mosaic_0001>
module attributes {stable_mosaic.version = 11 : i64} {
  func.func @_set2vec_kernel(%arg0: i32, %arg1: memref<2x8x128xbf16, #tpu.memory_space<vmem>>, %arg2: memref<128x128xbf16, #tpu.memory_space<vmem>>, %arg3: memref<1x128xf32, #tpu.memory_space<vmem>>, %arg4: memref<128x512xbf16, #tpu.memory_space<vmem>>, %arg5: memref<128x512xbf16, #tpu.memory_space<vmem>>, %arg6: memref<1x512xf32, #tpu.memory_space<vmem>>, %arg7: memref<128x128xbf16, #tpu.memory_space<vmem>>, %arg8: memref<128x128xbf16, #tpu.memory_space<vmem>>, %arg9: memref<1x128xf32, #tpu.memory_space<vmem>>, %arg10: memref<2x128xf32, #tpu.memory_space<vmem>>, %arg11: memref<2x8x128xbf16, #tpu.memory_space<vmem>>) attributes {dimension_semantics = [#tpu.dimension_semantics<parallel>], iteration_bounds = array<i64: 1>, scalar_prefetch = 0 : i64, scratch_operands = 1 : i64, tpu.core_type = #tpu.core_type<tc>, window_params = [{transform_indices = @transform_0, window_bounds = array<i64: 2, 8, 128>}, {pipeline_mode = #tpu.pipeline_mode<synchronous>, transform_indices = @transform_1, window_bounds = array<i64: 128, 128>}, {pipeline_mode = #tpu.pipeline_mode<synchronous>, transform_indices = @transform_2, window_bounds = array<i64: 1, 128>}, {pipeline_mode = #tpu.pipeline_mode<synchronous>, transform_indices = @transform_3, window_bounds = array<i64: 128, 512>}, {pipeline_mode = #tpu.pipeline_mode<synchronous>, transform_indices = @transform_4, window_bounds = array<i64: 128, 512>}, {pipeline_mode = #tpu.pipeline_mode<synchronous>, transform_indices = @transform_5, window_bounds = array<i64: 1, 512>}, {pipeline_mode = #tpu.pipeline_mode<synchronous>, transform_indices = @transform_6, window_bounds = array<i64: 128, 128>}, {pipeline_mode = #tpu.pipeline_mode<synchronous>, transform_indices = @transform_7, window_bounds = array<i64: 128, 128>}, {pipeline_mode = #tpu.pipeline_mode<synchronous>, transform_indices = @transform_8, window_bounds = array<i64: 1, 128>}, {transform_indices = @transform_9, window_bounds = array<i64: 2, 128>}]} {
    %c0 = arith.constant 0 : index
    %c0_0 = arith.constant 0 : index
    %c0_1 = arith.constant 0 : index
    %0 = vector.load %arg1[%c0, %c0_0, %c0_1] : memref<2x8x128xbf16, #tpu.memory_space<vmem>>, vector<2x8x128xbf16>
    %1 = vector.shape_cast %0 : vector<2x8x128xbf16> to vector<16x128xbf16>
    %c0_2 = arith.constant 0 : index
    %c0_3 = arith.constant 0 : index
    %2 = vector.load %arg2[%c0_2, %c0_3] : memref<128x128xbf16, #tpu.memory_space<vmem>>, vector<128x128xbf16>
    %cst = arith.constant dense<0.000000e+00> : vector<16x128xf32>
    %3 = tpu.matmul %1, %2, %cst {dimension_numbers = #tpu.dot_dimension_numbers<[1], [0], [0], [1], [0, 0, 1, 1], [], []>} : vector<16x128xbf16>, vector<128x128xbf16>, vector<16x128xf32> -> vector<16x128xf32>
    %c0_4 = arith.constant 0 : index
    %c0_5 = arith.constant 0 : index
    %4 = vector.load %arg3[%c0_4, %c0_5] : memref<1x128xf32, #tpu.memory_space<vmem>>, vector<1x128xf32>
    %5 = vector.broadcast %4 : vector<1x128xf32> to vector<16x128xf32>
    %6 = arith.addf %3, %5 : vector<16x128xf32>
    %7 = vector.shape_cast %6 : vector<16x128xf32> to vector<2x8x128xf32>
    %8 = arith.truncf %7 : vector<2x8x128xf32> to vector<2x8x128xbf16>
    %c0_6 = arith.constant 0 : index
    %c0_7 = arith.constant 0 : index
    %c0_8 = arith.constant 0 : index
    %9 = vector.load %arg11[%c0_6, %c0_7, %c0_8] : memref<2x8x128xbf16, #tpu.memory_space<vmem>>, vector<2x8x128xbf16>
    tpu.vector_store %arg11[%c0_6, %c0_7, %c0_8], %8 {strides = array<i32>} : memref<2x8x128xbf16, #tpu.memory_space<vmem>>, vector<2x8x128xbf16>,
    %cst_9 = arith.constant 0.000000e+00 : f32
    %10 = vector.broadcast %cst_9 : f32 to vector<2x128xf32>
    %cst_10 = arith.constant 0.000000e+00 : f32
    %11 = vector.broadcast %cst_10 : f32 to vector<2x128xf32>
    %cst_11 = arith.constant 0.000000e+00 : f32
    %12 = vector.broadcast %cst_11 : f32 to vector<2x128xf32>
    %13 = arith.truncf %10 : vector<2x128xf32> to vector<2x128xbf16>
    %c0_12 = arith.constant 0 : index
    %c0_13 = arith.constant 0 : index
    %14 = vector.load %arg4[%c0_12, %c0_13] : memref<128x512xbf16, #tpu.memory_space<vmem>>, vector<128x512xbf16>
    %cst_14 = arith.constant dense<0.000000e+00> : vector<2x512xf32>
    %15 = tpu.matmul %13, %14, %cst_14 {dimension_numbers = #tpu.dot_dimension_numbers<[1], [0], [0], [1], [0, 0, 1, 1], [], []>} : vector<2x128xbf16>, vector<128x512xbf16>, vector<2x512xf32> -> vector<2x512xf32>
    %16 = arith.truncf %12 : vector<2x128xf32> to vector<2x128xbf16>
    %c0_15 = arith.constant 0 : index
    %c0_16 = arith.constant 0 : index
    %17 = vector.load %arg5[%c0_15, %c0_16] : memref<128x512xbf16, #tpu.memory_space<vmem>>, vector<128x512xbf16>
    %cst_17 = arith.constant dense<0.000000e+00> : vector<2x512xf32>
    %18 = tpu.matmul %16, %17, %cst_17 {dimension_numbers = #tpu.dot_dimension_numbers<[1], [0], [0], [1], [0, 0, 1, 1], [], []>} : vector<2x128xbf16>, vector<128x512xbf16>, vector<2x512xf32> -> vector<2x512xf32>
    %19 = arith.addf %15, %18 : vector<2x512xf32>
    %c0_18 = arith.constant 0 : index
    %c0_19 = arith.constant 0 : index
    %20 = vector.load %arg6[%c0_18, %c0_19] : memref<1x512xf32, #tpu.memory_space<vmem>>, vector<1x512xf32>
    %21 = vector.broadcast %20 : vector<1x512xf32> to vector<2x512xf32>
    %22 = arith.addf %19, %21 : vector<2x512xf32>
    %23 = vector.extract_strided_slice %22 {offsets = [0, 0], sizes = [2, 128], strides = [1, 1]} : vector<2x512xf32> to vector<2x128xf32>
    %cst_20 = arith.constant 5.000000e-01 : f32
    %24 = vector.broadcast %cst_20 : f32 to vector<2x128xf32>
    %25 = arith.mulf %24, %23 : vector<2x128xf32>
    %26 = math.tanh %25 : vector<2x128xf32>
    %cst_21 = arith.constant 1.000000e+00 : f32
    %27 = vector.broadcast %cst_21 : f32 to vector<2x128xf32>
    %28 = arith.addf %26, %27 : vector<2x128xf32>
    %cst_22 = arith.constant 5.000000e-01 : f32
    %29 = vector.broadcast %cst_22 : f32 to vector<2x128xf32>
    %30 = arith.mulf %29, %28 : vector<2x128xf32>
    %31 = vector.extract_strided_slice %22 {offsets = [0, 128], sizes = [2, 128], strides = [1, 1]} : vector<2x512xf32> to vector<2x128xf32>
    %cst_23 = arith.constant 5.000000e-01 : f32
    %32 = vector.broadcast %cst_23 : f32 to vector<2x128xf32>
    %33 = arith.mulf %32, %31 : vector<2x128xf32>
    %34 = math.tanh %33 : vector<2x128xf32>
    %cst_24 = arith.constant 1.000000e+00 : f32
    %35 = vector.broadcast %cst_24 : f32 to vector<2x128xf32>
    %36 = arith.addf %34, %35 : vector<2x128xf32>
    %cst_25 = arith.constant 5.000000e-01 : f32
    %37 = vector.broadcast %cst_25 : f32 to vector<2x128xf32>
    %38 = arith.mulf %37, %36 : vector<2x128xf32>
    %39 = vector.extract_strided_slice %22 {offsets = [0, 256], sizes = [2, 128], strides = [1, 1]} : vector<2x512xf32> to vector<2x128xf32>
    %40 = math.tanh %39 : vector<2x128xf32>
    %41 = vector.extract_strided_slice %22 {offsets = [0, 384], sizes = [2, 128], strides = [1, 1]} : vector<2x512xf32> to vector<2x128xf32>
    %cst_26 = arith.constant 5.000000e-01 : f32
    %42 = vector.broadcast %cst_26 : f32 to vector<2x128xf32>
    %43 = arith.mulf %42, %41 : vector<2x128xf32>
    %44 = math.tanh %43 : vector<2x128xf32>
    %cst_27 = arith.constant 1.000000e+00 : f32
    %45 = vector.broadcast %cst_27 : f32 to vector<2x128xf32>
    %46 = arith.addf %44, %45 : vector<2x128xf32>
    %cst_28 = arith.constant 5.000000e-01 : f32
    %47 = vector.broadcast %cst_28 : f32 to vector<2x128xf32>
    %48 = arith.mulf %47, %46 : vector<2x128xf32>
    %49 = arith.mulf %38, %11 : vector<2x128xf32>
    %50 = arith.mulf %30, %40 : vector<2x128xf32>
    %51 = arith.addf %49, %50 : vector<2x128xf32>
    %52 = math.tanh %51 : vector<2x128xf32>
    %53 = arith.mulf %48, %52 : vector<2x128xf32>
    %c0_29 = arith.constant 0 : index
    %c0_30 = arith.constant 0 : index
    %c0_31 = arith.constant 0 : index
    %54 = vector.load %arg11[%c0_29, %c0_30, %c0_31] : memref<2x8x128xbf16, #tpu.memory_space<vmem>>, vector<2x8x128xbf16>
    %55 = arith.extf %54 : vector<2x8x128xbf16> to vector<2x8x128xf32>
    %56 = vector.shape_cast %53 : vector<2x128xf32> to vector<2x1x128xf32>
    %57 = vector.broadcast %56 : vector<2x1x128xf32> to vector<2x8x128xf32>
    %58 = arith.mulf %55, %57 : vector<2x8x128xf32>
    %cst_32 = arith.constant dense<0.000000e+00> : vector<2x8xf32>
    %59 = vector.multi_reduction <add>, %58, %cst_32 [2] : vector<2x8x128xf32> to vector<2x8xf32>
    %60 = vector.shape_cast %59 : vector<2x8xf32> to vector<2x8x1xf32>
    %cst_33 = arith.constant dense<0xFF800000> : vector<2x1xf32>
    %61 = vector.multi_reduction <maximumf>, %60, %cst_33 [1] : vector<2x8x1xf32> to vector<2x1xf32>
    %62 = vector.shape_cast %61 : vector<2x1xf32> to vector<2x1x1xf32>
    %63 = vector.broadcast %62 : vector<2x1x1xf32> to vector<2x8x1xf32>
    %64 = arith.subf %60, %63 : vector<2x8x1xf32>
    %65 = math.exp %64 : vector<2x8x1xf32>
    %cst_34 = arith.constant dense<0.000000e+00> : vector<2x1xf32>
    %66 = vector.multi_reduction <add>, %65, %cst_34 [1] : vector<2x8x1xf32> to vector<2x1xf32>
    %67 = vector.shape_cast %66 : vector<2x1xf32> to vector<2x1x1xf32>
    %68 = tpu.reciprocal %67 {approx = true} : vector<2x1x1xf32> -> vector<2x1x1xf32>
    %69 = vector.broadcast %68 : vector<2x1x1xf32> to vector<2x8x1xf32>
    %70 = arith.mulf %65, %69 : vector<2x8x1xf32>
    %71 = vector.broadcast %70 : vector<2x8x1xf32> to vector<2x8x128xf32>
    %72 = arith.mulf %71, %55 : vector<2x8x128xf32>
    %cst_35 = arith.constant dense<0.000000e+00> : vector<2x128xf32>
    %73 = vector.multi_reduction <add>, %72, %cst_35 [1] : vector<2x8x128xf32> to vector<2x128xf32>
    %74 = arith.truncf %53 : vector<2x128xf32> to vector<2x128xbf16>
    %c0_36 = arith.constant 0 : index
    %c0_37 = arith.constant 0 : index
    %75 = vector.load %arg4[%c0_36, %c0_37] : memref<128x512xbf16, #tpu.memory_space<vmem>>, vector<128x512xbf16>
    %cst_38 = arith.constant dense<0.000000e+00> : vector<2x512xf32>
    %76 = tpu.matmul %74, %75, %cst_38 {dimension_numbers = #tpu.dot_dimension_numbers<[1], [0], [0], [1], [0, 0, 1, 1], [], []>} : vector<2x128xbf16>, vector<128x512xbf16>, vector<2x512xf32> -> vector<2x512xf32>
    %77 = arith.truncf %73 : vector<2x128xf32> to vector<2x128xbf16>
    %c0_39 = arith.constant 0 : index
    %c0_40 = arith.constant 0 : index
    %78 = vector.load %arg5[%c0_39, %c0_40] : memref<128x512xbf16, #tpu.memory_space<vmem>>, vector<128x512xbf16>
    %cst_41 = arith.constant dense<0.000000e+00> : vector<2x512xf32>
    %79 = tpu.matmul %77, %78, %cst_41 {dimension_numbers = #tpu.dot_dimension_numbers<[1], [0], [0], [1], [0, 0, 1, 1], [], []>} : vector<2x128xbf16>, vector<128x512xbf16>, vector<2x512xf32> -> vector<2x512xf32>
    %80 = arith.addf %76, %79 : vector<2x512xf32>
    %c0_42 = arith.constant 0 : index
    %c0_43 = arith.constant 0 : index
    %81 = vector.load %arg6[%c0_42, %c0_43] : memref<1x512xf32, #tpu.memory_space<vmem>>, vector<1x512xf32>
    %82 = vector.broadcast %81 : vector<1x512xf32> to vector<2x512xf32>
    %83 = arith.addf %80, %82 : vector<2x512xf32>
    %84 = vector.extract_strided_slice %83 {offsets = [0, 0], sizes = [2, 128], strides = [1, 1]} : vector<2x512xf32> to vector<2x128xf32>
    %cst_44 = arith.constant 5.000000e-01 : f32
    %85 = vector.broadcast %cst_44 : f32 to vector<2x128xf32>
    %86 = arith.mulf %85, %84 : vector<2x128xf32>
    %87 = math.tanh %86 : vector<2x128xf32>
    %cst_45 = arith.constant 1.000000e+00 : f32
    %88 = vector.broadcast %cst_45 : f32 to vector<2x128xf32>
    %89 = arith.addf %87, %88 : vector<2x128xf32>
    %cst_46 = arith.constant 5.000000e-01 : f32
    %90 = vector.broadcast %cst_46 : f32 to vector<2x128xf32>
    %91 = arith.mulf %90, %89 : vector<2x128xf32>
    %92 = vector.extract_strided_slice %83 {offsets = [0, 128], sizes = [2, 128], strides = [1, 1]} : vector<2x512xf32> to vector<2x128xf32>
    %cst_47 = arith.constant 5.000000e-01 : f32
    %93 = vector.broadcast %cst_47 : f32 to vector<2x128xf32>
    %94 = arith.mulf %93, %92 : vector<2x128xf32>
    %95 = math.tanh %94 : vector<2x128xf32>
    %cst_48 = arith.constant 1.000000e+00 : f32
    %96 = vector.broadcast %cst_48 : f32 to vector<2x128xf32>
    %97 = arith.addf %95, %96 : vector<2x128xf32>
    %cst_49 = arith.constant 5.000000e-01 : f32
    %98 = vector.broadcast %cst_49 : f32 to vector<2x128xf32>
    %99 = arith.mulf %98, %97 : vector<2x128xf32>
    %100 = vector.extract_strided_slice %83 {offsets = [0, 256], sizes = [2, 128], strides = [1, 1]} : vector<2x512xf32> to vector<2x128xf32>
    %101 = math.tanh %100 : vector<2x128xf32>
    %102 = vector.extract_strided_slice %83 {offsets = [0, 384], sizes = [2, 128], strides = [1, 1]} : vector<2x512xf32> to vector<2x128xf32>
    %cst_50 = arith.constant 5.000000e-01 : f32
    %103 = vector.broadcast %cst_50 : f32 to vector<2x128xf32>
    %104 = arith.mulf %103, %102 : vector<2x128xf32>
    %105 = math.tanh %104 : vector<2x128xf32>
    %cst_51 = arith.constant 1.000000e+00 : f32
    %106 = vector.broadcast %cst_51 : f32 to vector<2x128xf32>
    %107 = arith.addf %105, %106 : vector<2x128xf32>
    %cst_52 = arith.constant 5.000000e-01 : f32
    %108 = vector.broadcast %cst_52 : f32 to vector<2x128xf32>
    %109 = arith.mulf %108, %107 : vector<2x128xf32>
    %110 = arith.mulf %99, %51 : vector<2x128xf32>
    %111 = arith.mulf %91, %101 : vector<2x128xf32>
    %112 = arith.addf %110, %111 : vector<2x128xf32>
    %113 = math.tanh %112 : vector<2x128xf32>
    %114 = arith.mulf %109, %113 : vector<2x128xf32>
    %c0_53 = arith.constant 0 : index
    %c0_54 = arith.constant 0 : index
    %c0_55 = arith.constant 0 : index
    %115 = vector.load %arg11[%c0_53, %c0_54, %c0_55] : memref<2x8x128xbf16, #tpu.memory_space<vmem>>, vector<2x8x128xbf16>
    %116 = arith.extf %115 : vector<2x8x128xbf16> to vector<2x8x128xf32>
    %117 = vector.shape_cast %114 : vector<2x128xf32> to vector<2x1x128xf32>
    %118 = vector.broadcast %117 : vector<2x1x128xf32> to vector<2x8x128xf32>
    %119 = arith.mulf %116, %118 : vector<2x8x128xf32>
    %cst_56 = arith.constant dense<0.000000e+00> : vector<2x8xf32>
    %120 = vector.multi_reduction <add>, %119, %cst_56 [2] : vector<2x8x128xf32> to vector<2x8xf32>
    %121 = vector.shape_cast %120 : vector<2x8xf32> to vector<2x8x1xf32>
    %cst_57 = arith.constant dense<0xFF800000> : vector<2x1xf32>
    %122 = vector.multi_reduction <maximumf>, %121, %cst_57 [1] : vector<2x8x1xf32> to vector<2x1xf32>
    %123 = vector.shape_cast %122 : vector<2x1xf32> to vector<2x1x1xf32>
    %124 = vector.broadcast %123 : vector<2x1x1xf32> to vector<2x8x1xf32>
    %125 = arith.subf %121, %124 : vector<2x8x1xf32>
    %126 = math.exp %125 : vector<2x8x1xf32>
    %cst_58 = arith.constant dense<0.000000e+00> : vector<2x1xf32>
    %127 = vector.multi_reduction <add>, %126, %cst_58 [1] : vector<2x8x1xf32> to vector<2x1xf32>
    %128 = vector.shape_cast %127 : vector<2x1xf32> to vector<2x1x1xf32>
    %129 = tpu.reciprocal %128 {approx = true} : vector<2x1x1xf32> -> vector<2x1x1xf32>
    %130 = vector.broadcast %129 : vector<2x1x1xf32> to vector<2x8x1xf32>
    %131 = arith.mulf %126, %130 : vector<2x8x1xf32>
    %132 = vector.broadcast %131 : vector<2x8x1xf32> to vector<2x8x128xf32>
    %133 = arith.mulf %132, %116 : vector<2x8x128xf32>
    %cst_59 = arith.constant dense<0.000000e+00> : vector<2x128xf32>
    %134 = vector.multi_reduction <add>, %133, %cst_59 [1] : vector<2x8x128xf32> to vector<2x128xf32>
    %135 = arith.truncf %114 : vector<2x128xf32> to vector<2x128xbf16>
    %c0_60 = arith.constant 0 : index
    %c0_61 = arith.constant 0 : index
    %136 = vector.load %arg4[%c0_60, %c0_61] : memref<128x512xbf16, #tpu.memory_space<vmem>>, vector<128x512xbf16>
    %cst_62 = arith.constant dense<0.000000e+00> : vector<2x512xf32>
    %137 = tpu.matmul %135, %136, %cst_62 {dimension_numbers = #tpu.dot_dimension_numbers<[1], [0], [0], [1], [0, 0, 1, 1], [], []>} : vector<2x128xbf16>, vector<128x512xbf16>, vector<2x512xf32> -> vector<2x512xf32>
    %138 = arith.truncf %134 : vector<2x128xf32> to vector<2x128xbf16>
    %c0_63 = arith.constant 0 : index
    %c0_64 = arith.constant 0 : index
    %139 = vector.load %arg5[%c0_63, %c0_64] : memref<128x512xbf16, #tpu.memory_space<vmem>>, vector<128x512xbf16>
    %cst_65 = arith.constant dense<0.000000e+00> : vector<2x512xf32>
    %140 = tpu.matmul %138, %139, %cst_65 {dimension_numbers = #tpu.dot_dimension_numbers<[1], [0], [0], [1], [0, 0, 1, 1], [], []>} : vector<2x128xbf16>, vector<128x512xbf16>, vector<2x512xf32> -> vector<2x512xf32>
    %141 = arith.addf %137, %140 : vector<2x512xf32>
    %c0_66 = arith.constant 0 : index
    %c0_67 = arith.constant 0 : index
    %142 = vector.load %arg6[%c0_66, %c0_67] : memref<1x512xf32, #tpu.memory_space<vmem>>, vector<1x512xf32>
    %143 = vector.broadcast %142 : vector<1x512xf32> to vector<2x512xf32>
    %144 = arith.addf %141, %143 : vector<2x512xf32>
    %145 = vector.extract_strided_slice %144 {offsets = [0, 0], sizes = [2, 128], strides = [1, 1]} : vector<2x512xf32> to vector<2x128xf32>
    %cst_68 = arith.constant 5.000000e-01 : f32
    %146 = vector.broadcast %cst_68 : f32 to vector<2x128xf32>
    %147 = arith.mulf %146, %145 : vector<2x128xf32>
    %148 = math.tanh %147 : vector<2x128xf32>
    %cst_69 = arith.constant 1.000000e+00 : f32
    %149 = vector.broadcast %cst_69 : f32 to vector<2x128xf32>
    %150 = arith.addf %148, %149 : vector<2x128xf32>
    %cst_70 = arith.constant 5.000000e-01 : f32
    %151 = vector.broadcast %cst_70 : f32 to vector<2x128xf32>
    %152 = arith.mulf %151, %150 : vector<2x128xf32>
    %153 = vector.extract_strided_slice %144 {offsets = [0, 128], sizes = [2, 128], strides = [1, 1]} : vector<2x512xf32> to vector<2x128xf32>
    %cst_71 = arith.constant 5.000000e-01 : f32
    %154 = vector.broadcast %cst_71 : f32 to vector<2x128xf32>
    %155 = arith.mulf %154, %153 : vector<2x128xf32>
    %156 = math.tanh %155 : vector<2x128xf32>
    %cst_72 = arith.constant 1.000000e+00 : f32
    %157 = vector.broadcast %cst_72 : f32 to vector<2x128xf32>
    %158 = arith.addf %156, %157 : vector<2x128xf32>
    %cst_73 = arith.constant 5.000000e-01 : f32
    %159 = vector.broadcast %cst_73 : f32 to vector<2x128xf32>
    %160 = arith.mulf %159, %158 : vector<2x128xf32>
    %161 = vector.extract_strided_slice %144 {offsets = [0, 256], sizes = [2, 128], strides = [1, 1]} : vector<2x512xf32> to vector<2x128xf32>
    %162 = math.tanh %161 : vector<2x128xf32>
    %163 = vector.extract_strided_slice %144 {offsets = [0, 384], sizes = [2, 128], strides = [1, 1]} : vector<2x512xf32> to vector<2x128xf32>
    %cst_74 = arith.constant 5.000000e-01 : f32
    %164 = vector.broadcast %cst_74 : f32 to vector<2x128xf32>
    %165 = arith.mulf %164, %163 : vector<2x128xf32>
    %166 = math.tanh %165 : vector<2x128xf32>
    %cst_75 = arith.constant 1.000000e+00 : f32
    %167 = vector.broadcast %cst_75 : f32 to vector<2x128xf32>
    %168 = arith.addf %166, %167 : vector<2x128xf32>
    %cst_76 = arith.constant 5.000000e-01 : f32
    %169 = vector.broadcast %cst_76 : f32 to vector<2x128xf32>
    %170 = arith.mulf %169, %168 : vector<2x128xf32>
    %171 = arith.mulf %160, %112 : vector<2x128xf32>
    %172 = arith.mulf %152, %162 : vector<2x128xf32>
    %173 = arith.addf %171, %172 : vector<2x128xf32>
    %174 = math.tanh %173 : vector<2x128xf32>
    %175 = arith.mulf %170, %174 : vector<2x128xf32>
    %c0_77 = arith.constant 0 : index
    %c0_78 = arith.constant 0 : index
    %c0_79 = arith.constant 0 : index
    %176 = vector.load %arg11[%c0_77, %c0_78, %c0_79] : memref<2x8x128xbf16, #tpu.memory_space<vmem>>, vector<2x8x128xbf16>
    %177 = arith.extf %176 : vector<2x8x128xbf16> to vector<2x8x128xf32>
    %178 = vector.shape_cast %175 : vector<2x128xf32> to vector<2x1x128xf32>
    %179 = vector.broadcast %178 : vector<2x1x128xf32> to vector<2x8x128xf32>
    %180 = arith.mulf %177, %179 : vector<2x8x128xf32>
    %cst_80 = arith.constant dense<0.000000e+00> : vector<2x8xf32>
    %181 = vector.multi_reduction <add>, %180, %cst_80 [2] : vector<2x8x128xf32> to vector<2x8xf32>
    %182 = vector.shape_cast %181 : vector<2x8xf32> to vector<2x8x1xf32>
    %cst_81 = arith.constant dense<0xFF800000> : vector<2x1xf32>
    %183 = vector.multi_reduction <maximumf>, %182, %cst_81 [1] : vector<2x8x1xf32> to vector<2x1xf32>
    %184 = vector.shape_cast %183 : vector<2x1xf32> to vector<2x1x1xf32>
    %185 = vector.broadcast %184 : vector<2x1x1xf32> to vector<2x8x1xf32>
    %186 = arith.subf %182, %185 : vector<2x8x1xf32>
    %187 = math.exp %186 : vector<2x8x1xf32>
    %cst_82 = arith.constant dense<0.000000e+00> : vector<2x1xf32>
    %188 = vector.multi_reduction <add>, %187, %cst_82 [1] : vector<2x8x1xf32> to vector<2x1xf32>
    %189 = vector.shape_cast %188 : vector<2x1xf32> to vector<2x1x1xf32>
    %190 = tpu.reciprocal %189 {approx = true} : vector<2x1x1xf32> -> vector<2x1x1xf32>
    %191 = vector.broadcast %190 : vector<2x1x1xf32> to vector<2x8x1xf32>
    %192 = arith.mulf %187, %191 : vector<2x8x1xf32>
    %193 = vector.broadcast %192 : vector<2x8x1xf32> to vector<2x8x128xf32>
    %194 = arith.mulf %193, %177 : vector<2x8x128xf32>
    %cst_83 = arith.constant dense<0.000000e+00> : vector<2x128xf32>
    %195 = vector.multi_reduction <add>, %194, %cst_83 [1] : vector<2x8x128xf32> to vector<2x128xf32>
    %196 = arith.truncf %175 : vector<2x128xf32> to vector<2x128xbf16>
    %c0_84 = arith.constant 0 : index
    %c0_85 = arith.constant 0 : index
    %197 = vector.load %arg7[%c0_84, %c0_85] : memref<128x128xbf16, #tpu.memory_space<vmem>>, vector<128x128xbf16>
    %cst_86 = arith.constant dense<0.000000e+00> : vector<2x128xf32>
    %198 = tpu.matmul %196, %197, %cst_86 {dimension_numbers = #tpu.dot_dimension_numbers<[1], [0], [0], [1], [0, 0, 1, 1], [], []>} : vector<2x128xbf16>, vector<128x128xbf16>, vector<2x128xf32> -> vector<2x128xf32>
    %199 = arith.truncf %195 : vector<2x128xf32> to vector<2x128xbf16>
    %c0_87 = arith.constant 0 : index
    %c0_88 = arith.constant 0 : index
    %200 = vector.load %arg8[%c0_87, %c0_88] : memref<128x128xbf16, #tpu.memory_space<vmem>>, vector<128x128xbf16>
    %cst_89 = arith.constant dense<0.000000e+00> : vector<2x128xf32>
    %201 = tpu.matmul %199, %200, %cst_89 {dimension_numbers = #tpu.dot_dimension_numbers<[1], [0], [0], [1], [0, 0, 1, 1], [], []>} : vector<2x128xbf16>, vector<128x128xbf16>, vector<2x128xf32> -> vector<2x128xf32>
    %202 = arith.addf %198, %201 : vector<2x128xf32>
    %c0_90 = arith.constant 0 : index
    %c0_91 = arith.constant 0 : index
    %203 = vector.load %arg9[%c0_90, %c0_91] : memref<1x128xf32, #tpu.memory_space<vmem>>, vector<1x128xf32>
    %204 = vector.broadcast %203 : vector<1x128xf32> to vector<2x128xf32>
    %205 = arith.addf %202, %204 : vector<2x128xf32>
    %c0_92 = arith.constant 0 : index
    %c0_93 = arith.constant 0 : index
    %206 = vector.load %arg10[%c0_92, %c0_93] : memref<2x128xf32, #tpu.memory_space<vmem>>, vector<2x128xf32>
    tpu.vector_store %arg10[%c0_92, %c0_93], %205 {strides = array<i32>} : memref<2x128xf32, #tpu.memory_space<vmem>>, vector<2x128xf32>,
    return
  }
  func.func @transform_0(%arg0: i32) -> (i32, i32, i32) {
    %c0_i32 = arith.constant 0 : i32
    %c0_i32_0 = arith.constant 0 : i32
    %c0_i32_1 = arith.constant 0 : i32
    return %arg0, %c0_i32, %c0_i32_0 : i32, i32, i32
  }
  func.func @transform_1(%arg0: i32) -> (i32, i32) {
    %c0_i32 = arith.constant 0 : i32
    %c0_i32_0 = arith.constant 0 : i32
    %c0_i32_1 = arith.constant 0 : i32
    return %c0_i32, %c0_i32_0 : i32, i32
  }
  func.func @transform_2(%arg0: i32) -> (i32, i32) {
    %c0_i32 = arith.constant 0 : i32
    %c0_i32_0 = arith.constant 0 : i32
    %c0_i32_1 = arith.constant 0 : i32
    return %c0_i32, %c0_i32_0 : i32, i32
  }
  func.func @transform_3(%arg0: i32) -> (i32, i32) {
    %c0_i32 = arith.constant 0 : i32
    %c0_i32_0 = arith.constant 0 : i32
    %c0_i32_1 = arith.constant 0 : i32
    return %c0_i32, %c0_i32_0 : i32, i32
  }
  func.func @transform_4(%arg0: i32) -> (i32, i32) {
    %c0_i32 = arith.constant 0 : i32
    %c0_i32_0 = arith.constant 0 : i32
    %c0_i32_1 = arith.constant 0 : i32
    return %c0_i32, %c0_i32_0 : i32, i32
  }
  func.func @transform_5(%arg0: i32) -> (i32, i32) {
    %c0_i32 = arith.constant 0 : i32
    %c0_i32_0 = arith.constant 0 : i32
    %c0_i32_1 = arith.constant 0 : i32
    return %c0_i32, %c0_i32_0 : i32, i32
  }
  func.func @transform_6(%arg0: i32) -> (i32, i32) {
    %c0_i32 = arith.constant 0 : i32
    %c0_i32_0 = arith.constant 0 : i32
    %c0_i32_1 = arith.constant 0 : i32
    return %c0_i32, %c0_i32_0 : i32, i32
  }
  func.func @transform_7(%arg0: i32) -> (i32, i32) {
    %c0_i32 = arith.constant 0 : i32
    %c0_i32_0 = arith.constant 0 : i32
    %c0_i32_1 = arith.constant 0 : i32
    return %c0_i32, %c0_i32_0 : i32, i32
  }
  func.func @transform_8(%arg0: i32) -> (i32, i32) {
    %c0_i32 = arith.constant 0 : i32
    %c0_i32_0 = arith.constant 0 : i32
    %c0_i32_1 = arith.constant 0 : i32
    return %c0_i32, %c0_i32_0 : i32, i32
  }
  func.func @transform_9(%arg0: i32) -> (i32, i32) {
    %c0_i32 = arith.constant 0 : i32
    %c0_i32_0 = arith.constant 0 : i32
    return %arg0, %c0_i32 : i32, i32
  }
}

</mosaic_0001>

<bundles_post_ra>
// kernel: tpu_custom_call.1
= control target key start
LH: loop header
LB: loop body
LE: loop exit
PB: predicated region body
PF: predicated region fallthrough
CT: control target
= control target key end

     0   :  { %14 = vsyncpa [#allocation4], 0  ;;  %s2628_s0 = inlined_call_operand.hbm [shape: bf16[2,8,128], index: 0, kind: input, shape index: {}]   ;;  %s2629_s1 = inlined_call_operand.hbm [shape: bf16[128,128], index: 1, kind: input, shape index: {}]   ;;  %s2630_s2 = inlined_call_operand.hbm [shape: f32[1,128], index: 2, kind: input, shape index: {}]   ;;  %s2631_s3 = inlined_call_operand.hbm [shape: bf16[128,512], index: 3, kind: input, shape index: {}]   ;;  %s2632_s4 = inlined_call_operand.hbm [shape: bf16[128,512], index: 4, kind: input, shape index: {}]   ;;  %s2633_s5 = inlined_call_operand.vmem [shape: f32[1,512], index: 5, kind: input, shape index: {}]   ;;  %s2634_s6 = inlined_call_operand.hbm [shape: bf16[128,128], index: 6, kind: input, shape index: {}]   ;;  %s2635_s7 = inlined_call_operand.hbm [shape: bf16[128,128], index: 7, kind: input, shape index: {}]   ;;  %s2636_s8 = inlined_call_operand.vmem [shape: f32[1,128], index: 8, kind: input, shape index: {}]   ;;  %s2637_s9 = inlined_call_operand.hbm [shape: f32[2,128], index: 9, kind: output, shape index: {}]  }
   0x1   :  { %15 = vsyncpa [#allocation7], 0 }
   0x2   :  { %16 = vsyncpa [#allocation10], 0 }
   0x3   :  { %17 = vsyncpa [#allocation13], 0 }
   0x4   :  { %18 = vsyncpa [#allocation5], 0  ;;  %s36_s11 = sshll.u32 %s2629_s1, 4  ;;  %s2127_s12 = smov [#allocation6]   ;;  %s37_s11 = int_to_ptr.hbm [resolvable:$true] %s36_s11 }
   0x5   :  { %s38_s13 = sshll.u32 %s2127_s12, 4  ;;  %s60_s16 = sshll.u32 %s2631_s3, 4  ;;  %s39_s13 = int_to_ptr.vmem [resolvable:$true] %s38_s13  ;;  %s61_s16 = int_to_ptr.hbm [resolvable:$true] %s60_s16 }
   0x6   :  { %s2128_s17 = smov 64   ;;  %s2129_s18 = smov 4  }
   0x7   :  { %44 = dma.hbm_to_vmem [thread:$0]  %s37_s11, 1024, %s39_s13, [#allocation7], %s2128_s17, %s2128_s17, %s2129_s18  }
   0x8   :  { %s2130_s19 = smov [#allocation9]   ;;  %s2131_s21 = smov 256  }
   0x9   :  { %s62_s20 = sshll.u32 %s2130_s19, 4  ;;  %s2132_s1 = smov 16   ;;  %s63_s20 = int_to_ptr.vmem [resolvable:$true] %s62_s20 }
   0xa   :  { %68 = dma.hbm_to_vmem [thread:$0]  %s61_s16, 4096, %s63_s20, [#allocation10], %s2131_s21, %s2131_s21, %s2132_s1  }
   0xb   :  { %s88_s3 = sshll.u32 %s2634_s6, 4  ;;  %s2133_s24 = smov [#allocation12]   ;;  %s89_s3 = int_to_ptr.hbm [resolvable:$true] %s88_s3 }
   0xc   :  { %s90_s25 = sshll.u32 %s2133_s24, 4  ;;  %s23_s28 = sshll.u32 %s2628_s0, 4  ;;  %s91_s25 = int_to_ptr.vmem [resolvable:$true] %s90_s25  ;;  %s24_s28 = int_to_ptr.hbm [resolvable:$true] %s23_s28 }
   0xd   :  { %96 = dma.hbm_to_vmem [thread:$0]  %s89_s3, 1024, %s91_s25, [#allocation13], %s2128_s17, %s2128_s17, %s2129_s18  }
   0xe   :  { %s2134_s29 = smov [#allocation3]   ;;  %s50_s12 = sshll.u32 %s2630_s2, 4  ;;  %s51_s12 = int_to_ptr.hbm [resolvable:$true] %s50_s12 }
   0xf   :  { %s25_s30 = sshll.u32 %s2134_s29, 4  ;;  %s73_s0 = sshll.u32 %s2632_s4, 4  ;;  %s26_s30 = int_to_ptr.vmem [resolvable:$true] %s25_s30  ;;  %s74_s0 = int_to_ptr.hbm [resolvable:$true] %s73_s0 }
  0x10   :  { %31 = dma.hbm_to_vmem [thread:$0]  %s24_s28, 128, %s26_s30, [#allocation4], %s2128_s17, %s2128_s17, %s2129_s18  }
  0x11   :  { %s2135_s14 = smov [#allocation8]   ;;  %s2136_s16 = smov [#allocation11]  }
  0x12   :  { %s52_s15 = sshll.u32 %s2135_s14, 4  ;;  %s75_s19 = sshll.u32 %s2136_s16, 4  ;;  %s53_s15 = int_to_ptr.vmem [resolvable:$true] %s52_s15  ;;  %s76_s19 = int_to_ptr.vmem [resolvable:$true] %s75_s19 }
  0x13   :  { %55 = dma.hbm_to_vmem [thread:$0]  %s51_s12, 16, %s53_s15, [#allocation7]  }
  0x14   :  { %s101_s2 = sshll.u32 %s2635_s7, 4  ;;  %s2137_s23 = smov [#allocation14]   ;;  %s102_s2 = int_to_ptr.hbm [resolvable:$true] %s101_s2 }
  0x15   :  { %81 = dma.hbm_to_vmem [thread:$0]  %s74_s0, 4096, %s76_s19, [#allocation10], %s2131_s21, %s2131_s21, %s2132_s1  }
  0x16   :  { %s103_s3 = sshll.u32 %s2137_s23, 4  ;;  %s104_s3 = int_to_ptr.vmem [resolvable:$true] %s103_s3 }
  0x17   :  { %109 = dma.hbm_to_vmem [thread:$0]  %s102_s2, 1024, %s104_s3, [#allocation13], %s2128_s17, %s2128_s17, %s2129_s18  }
  0x18   :  { %2117 = dma.done.wait [#allocation4], 128  }
  0x19   :  { %2118 = vsyncadd [#allocation4], 4294967168 }
  0x1a   :  { %2119 = dma.done.wait [#allocation7], 1040  }
  0x1b   :  { %2120 = vsyncadd [#allocation7], 4294966256 }
  0x1c   :  { %2121 = dma.done.wait [#allocation10], 8192  }
  0x1d   :  { %2122 = vsyncadd [#allocation10], 4294959104 }
  0x1e   :  { %2123 = dma.done.wait [#allocation13], 2048  }
  0x1f   :  { %2124 = vsyncadd [#allocation13], 4294965248  ;;  %v1766_v0 = vld [vmem:[#allocation6 + $0x38] sm:$0xff]  ;;  %v1827_v1 = vld [vmem:[#allocation11 + $0xe4] sm:$0xf]  ;;  %vm826_vm0 = vcmask 1041409  }
  0x20   :  { %v1554_v2 = vld [vmem:[#allocation11 + $0xf0] sm:$0xf0]  ;;  %v1552_v4 = vld [vmem:[#allocation11 + $0xe0] sm:$0xf]  ;;  %v1829_v5 = vld [vmem:[#allocation11 + $0xec] sm:$0xf0]  ;;  %217 = vmatpush.bf16.msra.mxu0 %v1766_v0 }
  0x21   :  { %v2229_v3 = vor.u32 %v1827_v1, %v1554_v2  ;;  %v1560_v6 = vld [vmem:[#allocation11 + $0xe8] sm:$0xf]  ;;  %v2231_v7 = vor.u32 %v1829_v5, %v1552_v4  ;;  %v1830_v8 = vld [vmem:[#allocation11 + $0xf4] sm:$0xf0]  ;;  %v1765_v9 = vld [vmem:[#allocation6 + $0x30] sm:$0xff]  ;;  %s2139_s18 = smov [#allocation15]  }
  0x22   :  { %v1823_v10 = vld [vmem:[#allocation11 + $0xc4] sm:$0xf]  ;;  %v2234_v11 = vor.u32 %v1830_v8, %v1560_v6  ;;  %v1538_v12 = vld [vmem:[#allocation11 + $0xd0] sm:$0xf0]  ;;  %v1536_v13 = vld [vmem:[#allocation11 + $0xc0] sm:$0xf] }
  0x23   :  { %472 = vmatpush.bf16.msra.mxu2 %v2229_v3  ;;  %v1825_v14 = vld [vmem:[#allocation11 + $0xcc] sm:$0xf0]  ;;  %459 = vmatpush.bf16.msra.mxu1 %v2231_v7  ;;  %v2237_v15 = vor.u32 %v1823_v10, %v1538_v12  ;;  %v1544_v17 = vld [vmem:[#allocation11 + $0xc8] sm:$0xf]  ;;  %v1826_v18 = vld [vmem:[#allocation11 + $0xd4] sm:$0xf0] }
  0x24   :  { %v2239_v16 = vor.u32 %v1825_v14, %v1536_v13  ;;  %v1764_v19 = vld [vmem:[#allocation6 + $0x28] sm:$0xff]  ;;  %485 = vmatpush.bf16.msra.mxu3 %v2234_v11  ;;  %v2242_v20 = vor.u32 %v1826_v18, %v1544_v17  ;;  %v1522_v22 = vld [vmem:[#allocation11 + $0xb0] sm:$0xf0]  ;;  %v1520_v23 = vld [vmem:[#allocation11 + $0xa0] sm:$0xf]  ;;  %218 = vmatpush.bf16.msra.mxu0 %v1765_v9  ;;  %s1387_s21 = sshll.u32 %s2139_s18, 4  ;;  %s1388_s21 = int_to_ptr.vmem [resolvable:$true] %s1387_s21 }
  0x25   :  { %v1819_v21 = vld [vmem:[#allocation11 + $0xa4] sm:$0xf]  ;;  %v1821_v24 = vld [vmem:[#allocation11 + $0xac] sm:$0xf0]  ;;  %v1528_v25 = vld [vmem:[#allocation11 + $0xa8] sm:$0xf] }
  0x26   :  { %v1822_v26 = vld [vmem:[#allocation11 + $0xb4] sm:$0xf0]  ;;  %v2245_v27 = vor.u32 %v1819_v21, %v1522_v22  ;;  %v2248_v28 = vor.u32 %v1821_v24, %v1520_v23  ;;  %v1815_v29 = vld [vmem:[#allocation11 + $0x84] sm:$0xf]  ;;  %v1506_v30 = vld [vmem:[#allocation11 + $0x90] sm:$0xf0] }
  0x27   :  { %473 = vmatpush.bf16.msra.mxu2 %v2237_v15  ;;  %460 = vmatpush.bf16.msra.mxu1 %v2239_v16  ;;  %v2251_v31 = vor.u32 %v1822_v26, %v1528_v25  ;;  %v1504_v32 = vld [vmem:[#allocation11 + $0x80] sm:$0xf]  ;;  %v1817_v33 = vld [vmem:[#allocation11 + $0x8c] sm:$0xf0]  ;;  %v1512_v35 = vld [vmem:[#allocation11 + $0x88] sm:$0xf]  ;;  %v2254_v37 = vor.u32 %v1815_v29, %v1506_v30 }
  0x28   :  { %486 = vmatpush.bf16.msra.mxu3 %v2242_v20  ;;  %219 = vmatpush.bf16.msra.mxu0 %v1764_v19  ;;  %v1763_v34 = vld [vmem:[#allocation6 + $0x20] sm:$0xff]  ;;  %v1818_v36 = vld [vmem:[#allocation11 + $0x94] sm:$0xf0]  ;;  %v2257_v38 = vor.u32 %v1817_v33, %v1504_v32  ;;  %v1490_v40 = vld [vmem:[#allocation11 + $0x70] sm:$0xf0]  ;;  %s1389_s25 = sshll.u32 %s2637_s9, 4  ;;  %s1390_s25 = int_to_ptr.hbm [resolvable:$true] %s1389_s25 }
  0x29   :  { %2681 = vst [vmem:[#allocation21_spill] sm:$0xff] %v2254_v37  ;;  %v1811_v39 = vld [vmem:[#allocation11 + $0x64] sm:$0xf]  ;;  %v2260_v41 = vor.u32 %v1818_v36, %v1512_v35  ;;  %v1488_v42 = vld [vmem:[#allocation11 + $0x60] sm:$0xf]  ;;  %v1762_v44 = vld [vmem:[#allocation6 + $0x18] sm:$0xff] }
  0x2a   :  { %v1813_v43 = vld [vmem:[#allocation11 + $0x6c] sm:$0xf0]  ;;  %v1496_v45 = vld [vmem:[#allocation11 + $0x68] sm:$0xf]  ;;  %v1814_v46 = vld [vmem:[#allocation11 + $0x74] sm:$0xf0]  ;;  %v2263_v47 = vor.u32 %v1811_v39, %v1490_v40 }
  0x2b   :  { %474 = vmatpush.bf16.msra.mxu2 %v2245_v27  ;;  %461 = vmatpush.bf16.msra.mxu1 %v2248_v28  ;;  %v2266_v48 = vor.u32 %v1813_v43, %v1488_v42  ;;  %v1807_v49 = vld [vmem:[#allocation11 + $0x44] sm:$0xf]  ;;  %v1474_v50 = vld [vmem:[#allocation11 + $0x50] sm:$0xf0]  ;;  %v2269_v51 = vor.u32 %v1814_v46, %v1496_v45  ;;  %v1472_v52 = vld [vmem:[#allocation11 + $0x40] sm:$0xf] }
  0x2c   :  { %487 = vmatpush.bf16.msra.mxu3 %v2251_v31  ;;  %220 = vmatpush.bf16.msra.mxu0 %v1763_v34  ;;  %v1809_v53 = vld [vmem:[#allocation11 + $0x4c] sm:$0xf0]  ;;  %v1480_v55 = vld [vmem:[#allocation11 + $0x48] sm:$0xf]  ;;  %v1810_v56 = vld [vmem:[#allocation11 + $0x54] sm:$0xf0]  ;;  %v2272_v57 = vor.u32 %v1807_v49, %v1474_v50 }
  0x2d   :  { %v1761_v54 = vld [vmem:[#allocation6 + $0x10] sm:$0xff]  ;;  %v2275_v58 = vor.u32 %v1809_v53, %v1472_v52  ;;  %v1803_v59 = vld [vmem:[#allocation11 + $0x24] sm:$0xf]  ;;  %v2278_v61 = vor.u32 %v1810_v56, %v1480_v55  ;;  %v1456_v62 = vld [vmem:[#allocation11 + $0x20] sm:$0xf] }
  0x2e   :  { %v1458_v60 = vld [vmem:[#allocation11 + $0x30] sm:$0xf0]  ;;  %v1805_v63 = vld [vmem:[#allocation11 + $0x2c] sm:$0xf0]  ;;  %v1760_v0 = vld [vmem:[#allocation6 + $0x8] sm:$0xff] }
  0x2f   :  { %475 = vmatpush.bf16.msra.mxu2 %v2254_v37  ;;  %462 = vmatpush.bf16.msra.mxu1 %v2257_v38  ;;  %v1464_v1 = vld [vmem:[#allocation11 + $0x28] sm:$0xf]  ;;  %v1806_v2 = vld [vmem:[#allocation11 + $0x34] sm:$0xf0]  ;;  %v2281_v4 = vor.u32 %v1803_v59, %v1458_v60  ;;  %v1799_v5 = vld [vmem:[#allocation11 + $0x4] sm:$0xf]  ;;  %v2284_v9 = vor.u32 %v1805_v63, %v1456_v62 }
  0x30   :  { %488 = vmatpush.bf16.msra.mxu3 %v2260_v41  ;;  %221 = vmatpush.bf16.msra.mxu0 %v1762_v44  ;;  %v1442_v6 = vld [vmem:[#allocation11 + $0x10] sm:$0xf0]  ;;  %v1828_v8 = vld [vmem:[#allocation11 + $0xec] sm:$0xf]  ;;  %v1759_v10 = vld [vmem:[#allocation6] sm:$0xff]  ;;  %v2287_v17 = vor.u32 %v1806_v2, %v1464_v1  ;;  %v2638_v1 = vmov 0  }
  0x31   :  { %v1562_v12 = vld [vmem:[#allocation11 + $0xf8] sm:$0xf0]  ;;  %v1795_v13 = vld [vmem:[#allocation9 + $0xe4] sm:$0xf]  ;;  %v1682_v14 = vld [vmem:[#allocation9 + $0xf0] sm:$0xf0]  ;;  %v2290_v25 = vor.u32 %v1799_v5, %v1442_v6 }
  0x32   :  { %v1440_v18 = vld [vmem:[#allocation11] sm:$0xf]  ;;  %v1801_v19 = vld [vmem:[#allocation11 + $0xc] sm:$0xf0]  ;;  %v1448_v21 = vld [vmem:[#allocation11 + $0x8] sm:$0xf]  ;;  %v2292_v26 = vor.u32 %v1828_v8, %v1562_v12  ;;  %v2295_v32 = vor.u32 %v1795_v13, %v1682_v14 }
  0x33   :  { %476 = vmatpush.bf16.msra.mxu2 %v2263_v47  ;;  %463 = vmatpush.bf16.msra.mxu1 %v2266_v48  ;;  %v1802_v22 = vld [vmem:[#allocation11 + $0x14] sm:$0xf0]  ;;  %v1680_v23 = vld [vmem:[#allocation9 + $0xe0] sm:$0xf]  ;;  %v1797_v24 = vld [vmem:[#allocation9 + $0xec] sm:$0xf0]  ;;  %v2297_v33 = vor.u32 %v1801_v19, %v1440_v18 }
  0x34   :  { %489 = vmatpush.bf16.msra.mxu3 %v2269_v51  ;;  %222 = vmatpush.bf16.msra.mxu0 %v1761_v54  ;;  %v1688_v29 = vld [vmem:[#allocation9 + $0xe8] sm:$0xf]  ;;  %v1798_v30 = vld [vmem:[#allocation9 + $0xf4] sm:$0xf0]  ;;  %v1824_v34 = vld [vmem:[#allocation11 + $0xcc] sm:$0xf]  ;;  %v2300_v36 = vor.u32 %v1802_v22, %v1448_v21  ;;  %v2302_v39 = vor.u32 %v1797_v24, %v1680_v23 }
  0x35   :  { %v1546_v35 = vld [vmem:[#allocation11 + $0xd8] sm:$0xf0]  ;;  %v1791_v40 = vld [vmem:[#allocation9 + $0xc4] sm:$0xf]  ;;  %v1666_v42 = vld [vmem:[#allocation9 + $0xd0] sm:$0xf0]  ;;  %v2304_v43 = vor.u32 %v1798_v30, %v1688_v29 }
  0x36   :  { %v1664_v44 = vld [vmem:[#allocation9 + $0xc0] sm:$0xf]  ;;  %v1793_v45 = vld [vmem:[#allocation9 + $0xcc] sm:$0xf0]  ;;  %v2308_v46 = vor.u32 %v1824_v34, %v1546_v35  ;;  %v1672_v49 = vld [vmem:[#allocation9 + $0xc8] sm:$0xf]  ;;  %v2312_v52 = vor.u32 %v1791_v40, %v1666_v42 }
  0x37   :  { %477 = vmatpush.bf16.msra.mxu2 %v2272_v57  ;;  %464 = vmatpush.bf16.msra.mxu1 %v2275_v58  ;;  %v1794_v50 = vld [vmem:[#allocation9 + $0xd4] sm:$0xf0]  ;;  %v1820_v53 = vld [vmem:[#allocation11 + $0xac] sm:$0xf]  ;;  %v1530_v54 = vld [vmem:[#allocation11 + $0xb8] sm:$0xf0]  ;;  %v2316_v55 = vor.u32 %v1793_v45, %v1664_v44 }
  0x38   :  { %490 = vmatpush.bf16.msra.mxu3 %v2278_v61  ;;  %223 = vmatpush.bf16.msra.mxu0 %v1760_v0  ;;  %v1787_v56 = vld [vmem:[#allocation9 + $0xa4] sm:$0xf]  ;;  %v1650_v59 = vld [vmem:[#allocation9 + $0xb0] sm:$0xf0]  ;;  %v2319_v62 = vor.u32 %v1794_v50, %v1672_v49  ;;  %v1648_v63 = vld [vmem:[#allocation9 + $0xa0] sm:$0xf]  ;;  %v2323_v2 = vor.u32 %v1820_v53, %v1530_v54 }
  0x39   :  { %v1758_v60 = vld [vmem:[#allocation3] sm:$0xff]  ;;  %v1789_v0 = vld [vmem:[#allocation9 + $0xac] sm:$0xf0]  ;;  %v1656_v5 = vld [vmem:[#allocation9 + $0xa8] sm:$0xf]  ;;  %v2327_v8 = vor.u32 %v1787_v56, %v1650_v59 }
  0x3a   :  { %v1790_v6 = vld [vmem:[#allocation9 + $0xb4] sm:$0xf0]  ;;  %v1514_v12 = vld [vmem:[#allocation11 + $0x98] sm:$0xf0]  ;;  %v2331_v13 = vor.u32 %v1789_v0, %v1648_v63  ;;  %v1783_v14 = vld [vmem:[#allocation9 + $0x84] sm:$0xf] }
  0x3b   :  { %478 = vmatpush.bf16.msra.mxu2 %v2281_v4  ;;  %465 = vmatpush.bf16.msra.mxu1 %v2284_v9  ;;  %2682 = vst [vmem:[#allocation22_spill] sm:$0xff] %v2327_v8  ;;  %v1634_v18 = vld [vmem:[#allocation9 + $0x90] sm:$0xf0]  ;;  %v2334_v19 = vor.u32 %v1790_v6, %v1656_v5  ;;  %v1632_v21 = vld [vmem:[#allocation9 + $0x80] sm:$0xf] }
  0x3c   :  { %491 = vmatpush.bf16.msra.mxu3 %v2287_v17  ;;  %224 = vmatpush.bf16.msra.mxu0 %v1759_v10  ;;  %v1816_v10 = vld [vmem:[#allocation11 + $0x8c] sm:$0xf]  ;;  %2683 = vst [vmem:[#allocation23_spill] sm:$0xff] %v2331_v13  ;;  %v1785_v22 = vld [vmem:[#allocation9 + $0x8c] sm:$0xf0]  ;;  %v2340_v30 = vor.u32 %v1783_v14, %v1634_v18 }
  0x3d   :  { %2684 = vst [vmem:[#allocation24_spill] sm:$0xff] %v2334_v19  ;;  %v2337_v23 = vor.u32 %v1816_v10, %v1514_v12  ;;  %v1640_v24 = vld [vmem:[#allocation9 + $0x88] sm:$0xf]  ;;  %v1786_v29 = vld [vmem:[#allocation9 + $0x94] sm:$0xf0]  ;;  %v2343_v40 = vor.u32 %v1785_v22, %v1632_v21 }
  0x3e   :  { %2685 = vst [vmem:[#allocation25_spill] sm:$0xff] %v2340_v30  ;;  %v1812_v34 = vld [vmem:[#allocation11 + $0x6c] sm:$0xf]  ;;  %v1498_v35 = vld [vmem:[#allocation11 + $0x78] sm:$0xf0]  ;;  %v2346_v45 = vor.u32 %v1786_v29, %v1640_v24 }
  0x3f   :  { %479 = vmatpush.bf16.msra.mxu2 %v2290_v25  ;;  %466 = vmatpush.bf16.msra.mxu1 %v2297_v33  ;;  %2686 = vst [vmem:[#allocation26_spill] sm:$0xff] %v2343_v40  ;;  %v1779_v42 = vld [vmem:[#allocation9 + $0x64] sm:$0xf]  ;;  %v1618_v44 = vld [vmem:[#allocation9 + $0x70] sm:$0xf0]  ;;  %v2349_v53 = vor.u32 %v1812_v34, %v1498_v35 }
  0x40   :  { %498 = vmatpush.bf16.msrb.mxu0 %v2292_v26  ;;  %492 = vmatpush.bf16.msra.mxu3 %v2300_v36  ;;  %2687 = vst [vmem:[#allocation27_spill] sm:$0xff] %v2346_v45  ;;  %v1616_v49 = vld [vmem:[#allocation9 + $0x60] sm:$0xf]  ;;  %v1781_v50 = vld [vmem:[#allocation9 + $0x6c] sm:$0xf0]  ;;  %v2352_v59 = vor.u32 %v1779_v42, %v1618_v44 }
  0x41   :  { %225 = vmatmul.bf16.vlgmr.msra.gmra.mxu0 %v1758_v60  ;;  %v1624_v54 = vld [vmem:[#allocation9 + $0x68] sm:$0xf]  ;;  %v1782_v56 = vld [vmem:[#allocation9 + $0x74] sm:$0xf0]  ;;  %v1808_v60 = vld [vmem:[#allocation11 + $0x4c] sm:$0xf]  ;;  %v2355_v0 = vor.u32 %v1781_v50, %v1616_v49 }
  0x42   :  { %480 = vmatmul.bf16.vlgmr.msra.gmra.mxu2 %v2638_v1  ;;  %467 = vmatmul.bf16.vlgmr.msra.gmra.mxu1 %v2638_v1  ;;  %2688 = vst [vmem:[#allocation28_spill] sm:$0xff] %v2352_v59  ;;  %v1482_v63 = vld [vmem:[#allocation11 + $0x58] sm:$0xf0]  ;;  %v1775_v5 = vld [vmem:[#allocation9 + $0x44] sm:$0xf]  ;;  %v2358_v10 = vor.u32 %v1782_v56, %v1624_v54 }
  0x43   :  { %684 = vmatpush.bf16.msrb.mxu2 %v2295_v32  ;;  %671 = vmatpush.bf16.msrb.mxu1 %v2302_v39  ;;  %2689 = vst [vmem:[#allocation29_spill] sm:$0xff] %v2355_v0  ;;  %v1602_v6 = vld [vmem:[#allocation9 + $0x50] sm:$0xf0]  ;;  %v1600_v12 = vld [vmem:[#allocation9 + $0x40] sm:$0xf]  ;;  %v2361_v18 = vor.u32 %v1808_v60, %v1482_v63 }
  0x44   :  { %697 = vmatpush.bf16.msrb.mxu3 %v2304_v43  ;;  %499 = vmatpush.bf16.msrb.mxu0 %v2308_v46  ;;  %2690 = vst [vmem:[#allocation30_spill] sm:$0xff] %v2358_v10  ;;  %v1777_v14 = vld [vmem:[#allocation9 + $0x4c] sm:$0xf0]  ;;  %v1608_v21 = vld [vmem:[#allocation9 + $0x48] sm:$0xf]  ;;  %v2364_v24 = vor.u32 %v1775_v5, %v1602_v6 }
  0x45   :  { %493 = vmatmul.bf16.vlgmr.msra.gmra.mxu3 %v2638_v1  ;;  %2691 = vst [vmem:[#allocation31_spill] sm:$0xff] %v2361_v18  ;;  %v1778_v22 = vld [vmem:[#allocation9 + $0x54] sm:$0xf0]  ;;  %v1804_v29 = vld [vmem:[#allocation11 + $0x2c] sm:$0xf]  ;;  %v2367_v35 = vor.u32 %v1777_v14, %v1600_v12 }
  0x46   :  { %2692 = vst [vmem:[#allocation32_spill] sm:$0xff] %v2364_v24  ;;  %v1466_v34 = vld [vmem:[#allocation11 + $0x38] sm:$0xf0]  ;;  %v1771_v42 = vld [vmem:[#allocation9 + $0x24] sm:$0xf]  ;;  %v2370_v49 = vor.u32 %v1778_v22, %v1608_v21 }
  0x47   :  { %685 = vmatpush.bf16.msrb.mxu2 %v2312_v52  ;;  %672 = vmatpush.bf16.msrb.mxu1 %v2316_v55  ;;  %2693 = vst [vmem:[#allocation33_spill] sm:$0xff] %v2367_v35  ;;  %v1586_v44 = vld [vmem:[#allocation9 + $0x30] sm:$0xf0]  ;;  %v1584_v50 = vld [vmem:[#allocation9 + $0x20] sm:$0xf]  ;;  %v2373_v56 = vor.u32 %v1804_v29, %v1466_v34 }
  0x48   :  { %698 = vmatpush.bf16.msrb.mxu3 %v2319_v62  ;;  %500 = vmatpush.bf16.msrb.mxu0 %v2323_v2  ;;  %2694 = vst [vmem:[#allocation34_spill] sm:$0xff] %v2370_v49  ;;  %v1773_v54 = vld [vmem:[#allocation9 + $0x2c] sm:$0xf0]  ;;  %v1592_v60 = vld [vmem:[#allocation9 + $0x28] sm:$0xf]  ;;  %v2376_v5 = vor.u32 %v1771_v42, %v1586_v44 }
  0x49   :  { %v1774_v63 = vld [vmem:[#allocation9 + $0x34] sm:$0xf0]  ;;  %v1800_v6 = vld [vmem:[#allocation11 + $0xc] sm:$0xf]  ;;  %v1450_v12 = vld [vmem:[#allocation11 + $0x18] sm:$0xf0]  ;;  %v2379_v1 = vor.u32 %v1773_v54, %v1584_v50 }
  0x4a   :  { %2695 = vst [vmem:[#allocation35_spill] sm:$0xff] %v2376_v5  ;;  %v1767_v14 = vld [vmem:[#allocation9 + $0x4] sm:$0xf]  ;;  %v1570_v21 = vld [vmem:[#allocation9 + $0x10] sm:$0xf0]  ;;  %v2382_v29 = vor.u32 %v1774_v63, %v1592_v60  ;;  %v2385_v42 = vor.u32 %v1800_v6, %v1450_v12 }
  0x4b   :  { %686 = vmatpush.bf16.msrb.mxu2 %v2327_v8  ;;  %673 = vmatpush.bf16.msrb.mxu1 %v2331_v13  ;;  %2696 = vst [vmem:[#allocation36_spill] sm:$0xff] %v2379_v1  ;;  %v1796_v22 = vld [vmem:[#allocation9 + $0xec] sm:$0xf]  ;;  %v1568_v34 = vld [vmem:[#allocation9] sm:$0xf] }
  0x4c   :  { %699 = vmatpush.bf16.msrb.mxu3 %v2334_v19  ;;  %501 = vmatpush.bf16.msrb.mxu0 %v2337_v23  ;;  %2697 = vst [vmem:[#allocation37_spill] sm:$0xff] %v2382_v29  ;;  %v1576_v44 = vld [vmem:[#allocation9 + $0x8] sm:$0xf]  ;;  %v1792_v60 = vld [vmem:[#allocation9 + $0xcc] sm:$0xf] }
  0x4d   :  { %v1674_v63 = vld [vmem:[#allocation9 + $0xd8] sm:$0xf0] }
  0x4e   :  { %v2401_v6 = vor.u32 %v1792_v60, %v1674_v63  ;;  %v1658_v12 = vld [vmem:[#allocation9 + $0xb8] sm:$0xf0]  ;;  %v1776_v63 = vld [vmem:[#allocation9 + $0x4c] sm:$0xf] }
  0x4f   :  { %687 = vmatpush.bf16.msrb.mxu2 %v2340_v30  ;;  %674 = vmatpush.bf16.msrb.mxu1 %v2343_v40 }
  0x50   :  { %700 = vmatpush.bf16.msrb.mxu3 %v2346_v45  ;;  %502 = vmatpush.bf16.msrb.mxu0 %v2349_v53  ;;  %2701 = vst [vmem:[#allocation41_spill] sm:$0xff] %v2401_v6 }
  0x53   :  { %688 = vmatpush.bf16.msrb.mxu2 %v2352_v59  ;;  %675 = vmatpush.bf16.msrb.mxu1 %v2355_v0 }
  0x54   :  { %701 = vmatpush.bf16.msrb.mxu3 %v2358_v10  ;;  %503 = vmatpush.bf16.msrb.mxu0 %v2361_v18  ;;  %v1690_v10 = vld [vmem:[#allocation9 + $0xf8] sm:$0xf0]  ;;  %v1769_v18 = vld [vmem:[#allocation9 + $0xc] sm:$0xf0] }
  0x55   :  { %v2390_v50 = vor.u32 %v1796_v22, %v1690_v10  ;;  %v2393_v54 = vor.u32 %v1769_v18, %v1568_v34  ;;  %v1788_v10 = vld [vmem:[#allocation9 + $0xac] sm:$0xf]  ;;  %v2702_v18 = vmov 0  }
  0x56   :  { %v1780_v34 = vld [vmem:[#allocation9 + $0x6c] sm:$0xf] }
  0x57   :  { %689 = vmatpush.bf16.msrb.mxu2 %v2364_v24  ;;  %676 = vmatpush.bf16.msrb.mxu1 %v2367_v35  ;;  %v1770_v24 = vld [vmem:[#allocation9 + $0x14] sm:$0xf0]  ;;  %v2388_v35 = vor.u32 %v1767_v14, %v1570_v21  ;;  %2699 = vst [vmem:[#allocation39_spill] sm:$0xff] %v2393_v54  ;;  %v1784_v14 = vld [vmem:[#allocation9 + $0x8c] sm:$0xf] }
  0x58   :  { %702 = vmatpush.bf16.msrb.mxu3 %v2370_v49  ;;  %504 = vmatpush.bf16.msrb.mxu0 %v2373_v56  ;;  %v2396_v49 = vor.u32 %v1770_v24, %v1576_v44  ;;  %v2411_v24 = vor.u32 %v1788_v10, %v1658_v12  ;;  %v1642_v21 = vld [vmem:[#allocation9 + $0x98] sm:$0xf0] }
  0x59   :  { %2698 = vst [vmem:[#allocation38_spill] sm:$0xff] %v2388_v35  ;;  %v2418_v22 = vor.u32 %v1784_v14, %v1642_v21  ;;  %v1626_v44 = vld [vmem:[#allocation9 + $0x78] sm:$0xf0]  ;;  %v1772_v14 = vld [vmem:[#allocation9 + $0x2c] sm:$0xf] }
  0x5a   :  { %2700 = vst [vmem:[#allocation40_spill] sm:$0xff] %v2396_v49  ;;  %v2424_v60 = vor.u32 %v1780_v34, %v1626_v44  ;;  %v1610_v10 = vld [vmem:[#allocation9 + $0x58] sm:$0xf0]  ;;  %v1768_v44 = vld [vmem:[#allocation9 + $0xc] sm:$0xf] }
  0x5b   :  { %690 = vmatpush.bf16.msrb.mxu2 %v2376_v5  ;;  %677 = vmatpush.bf16.msrb.mxu1 %v2379_v1  ;;  %2703 = vst [vmem:[#allocation42_spill] sm:$0xff] %v2411_v24  ;;  %v2430_v12 = vor.u32 %v1776_v63, %v1610_v10  ;;  %v1594_v21 = vld [vmem:[#allocation9 + $0x38] sm:$0xf0]  ;;  %v2711_v10 = vld [vmem:[#allocation30_spill] sm:$0xff] }
  0x5c   :  { %703 = vmatpush.bf16.msrb.mxu3 %v2382_v29  ;;  %505 = vmatpush.bf16.msrb.mxu0 %v2385_v42  ;;  %2704 = vst [vmem:[#allocation43_spill] sm:$0xff] %v2418_v22  ;;  %v2436_v34 = vor.u32 %v1772_v14, %v1594_v21  ;;  %v2712_v14 = vld [vmem:[#allocation33_spill] sm:$0xff]  ;;  %v2713_v21 = vld [vmem:[#allocation34_spill] sm:$0xff] }
  0x5d   :  { %2705 = vst [vmem:[#allocation44_spill] sm:$0xff] %v2424_v60 }
  0x5e   :  { %2706 = vst [vmem:[#allocation45_spill] sm:$0xff] %v2430_v12 }
  0x5f   :  { %691 = vmatpush.bf16.msrb.mxu2 %v2388_v35  ;;  %678 = vmatpush.bf16.msrb.mxu1 %v2393_v54  ;;  %2707 = vst [vmem:[#allocation46_spill] sm:$0xff] %v2436_v34 }
  0x60   :  { %710 = vmatpush.bf16.msra.mxu0 %v2390_v50  ;;  %704 = vmatpush.bf16.msrb.mxu3 %v2396_v49 }
  0x61   :  { %506 = vmatmul.bf16.vlgmr.msrb.gmra.mxu0 %v2702_v18 }
  0x62   :  { %692 = vmatmul.bf16.vlgmr.msrb.gmra.mxu2 %v2702_v18  ;;  %679 = vmatmul.bf16.vlgmr.msrb.gmra.mxu1 %v2702_v18 }
  0x63   :  { %843 = vmatpush.bf16.msra.mxu2 %v2229_v3  ;;  %830 = vmatpush.bf16.msra.mxu1 %v2231_v7 }
  0x64   :  { %711 = vmatpush.bf16.msra.mxu0 %v2401_v6  ;;  %705 = vmatmul.bf16.vlgmr.msrb.gmra.mxu3 %v2702_v18 }
  0x65   :  { %856 = vmatpush.bf16.msra.mxu3 %v2234_v11 }
  0x67   :  { %844 = vmatpush.bf16.msra.mxu2 %v2237_v15  ;;  %831 = vmatpush.bf16.msra.mxu1 %v2239_v16 }
  0x68   :  { %712 = vmatpush.bf16.msra.mxu0 %v2411_v24 }
  0x69   :  { %857 = vmatpush.bf16.msra.mxu3 %v2242_v20 }
  0x6b   :  { %845 = vmatpush.bf16.msra.mxu2 %v2245_v27  ;;  %832 = vmatpush.bf16.msra.mxu1 %v2248_v28 }
  0x6c   :  { %713 = vmatpush.bf16.msra.mxu0 %v2418_v22 }
  0x6d   :  { %858 = vmatpush.bf16.msra.mxu3 %v2251_v31 }
  0x6f   :  { %846 = vmatpush.bf16.msra.mxu2 %v2254_v37  ;;  %833 = vmatpush.bf16.msra.mxu1 %v2257_v38  ;;  %v1578_v37 = vld [vmem:[#allocation9 + $0x18] sm:$0xf0] }
  0x70   :  { %714 = vmatpush.bf16.msra.mxu0 %v2424_v60  ;;  %v2442_v63 = vor.u32 %v1768_v44, %v1578_v37  ;;  %v2709_v37 = vld [vmem:[#allocation31_spill] sm:$0xff] }
  0x71   :  { %859 = vmatpush.bf16.msra.mxu3 %v2260_v41 }
  0x72   :  { %2708 = vst [vmem:[#allocation47_spill] sm:$0xff] %v2442_v63 }
  0x73   :  { %847 = vmatpush.bf16.msra.mxu2 %v2263_v47  ;;  %834 = vmatpush.bf16.msra.mxu1 %v2266_v48 }
  0x74   :  { %715 = vmatpush.bf16.msra.mxu0 %v2430_v12 }
  0x75   :  { %860 = vmatpush.bf16.msra.mxu3 %v2269_v51 }
  0x77   :  { %848 = vmatpush.bf16.msra.mxu2 %v2272_v57  ;;  %835 = vmatpush.bf16.msra.mxu1 %v2275_v58 }
  0x78   :  { %716 = vmatpush.bf16.msra.mxu0 %v2436_v34 }
  0x79   :  { %861 = vmatpush.bf16.msra.mxu3 %v2278_v61 }
  0x7b   :  { %849 = vmatpush.bf16.msra.mxu2 %v2281_v4  ;;  %836 = vmatpush.bf16.msra.mxu1 %v2284_v9 }
  0x7c   :  { %717 = vmatpush.bf16.msra.mxu0 %v2442_v63 }
  0x7d   :  { %862 = vmatpush.bf16.msra.mxu3 %v2287_v17 }
  0x7f   :  { %850 = vmatpush.bf16.msra.mxu2 %v2290_v25  ;;  %718 = vmatmul.bf16.vlgmr.msra.gmra.mxu0 %v2702_v18  ;;  %v2710_v18 = vld [vmem:[#allocation32_spill] sm:$0xff] }
  0x80   :  { %869 = vmatpush.bf16.msrb.mxu0 %v2292_v26  ;;  %837 = vmatpush.bf16.msra.mxu1 %v2297_v33 }
  0x81   :  { %863 = vmatpush.bf16.msra.mxu3 %v2300_v36 }
  0x83   :  { %895 = vmatpush.bf16.msrb.mxu2 %v2295_v32 }
  0x84   :  { %882 = vmatpush.bf16.msrb.mxu1 %v2302_v39  ;;  %870 = vmatpush.bf16.msrb.mxu0 %v2308_v46 }
  0x85   :  { %908 = vmatpush.bf16.msrb.mxu3 %v2304_v43 }
  0x87   :  { %896 = vmatpush.bf16.msrb.mxu2 %v2312_v52 }
  0x88   :  { %883 = vmatpush.bf16.msrb.mxu1 %v2316_v55  ;;  %871 = vmatpush.bf16.msrb.mxu0 %v2323_v2 }
  0x89   :  { %909 = vmatpush.bf16.msrb.mxu3 %v2319_v62 }
  0x8b   :  { %897 = vmatpush.bf16.msrb.mxu2 %v2327_v8 }
  0x8c   :  { %884 = vmatpush.bf16.msrb.mxu1 %v2331_v13  ;;  %872 = vmatpush.bf16.msrb.mxu0 %v2337_v23 }
  0x8d   :  { %910 = vmatpush.bf16.msrb.mxu3 %v2334_v19 }
  0x8f   :  { %898 = vmatpush.bf16.msrb.mxu2 %v2340_v30 }
  0x90   :  { %885 = vmatpush.bf16.msrb.mxu1 %v2343_v40  ;;  %873 = vmatpush.bf16.msrb.mxu0 %v2349_v53 }
  0x91   :  { %911 = vmatpush.bf16.msrb.mxu3 %v2346_v45 }
  0x93   :  { %899 = vmatpush.bf16.msrb.mxu2 %v2352_v59 }
  0x94   :  { %886 = vmatpush.bf16.msrb.mxu1 %v2355_v0  ;;  %874 = vmatpush.bf16.msrb.mxu0 %v2709_v37 }
  0x95   :  { %912 = vmatpush.bf16.msrb.mxu3 %v2711_v10 }
  0x97   :  { %900 = vmatpush.bf16.msrb.mxu2 %v2710_v18 }
  0x98   :  { %887 = vmatpush.bf16.msrb.mxu1 %v2712_v14  ;;  %875 = vmatpush.bf16.msrb.mxu0 %v2373_v56 }
  0x99   :  { %913 = vmatpush.bf16.msrb.mxu3 %v2713_v21 }
  0x9b   :  { %901 = vmatpush.bf16.msrb.mxu2 %v2376_v5 }
  0x9c   :  { %888 = vmatpush.bf16.msrb.mxu1 %v2379_v1  ;;  %876 = vmatpush.bf16.msrb.mxu0 %v2385_v42 }
  0x9d   :  { %914 = vmatpush.bf16.msrb.mxu3 %v2382_v29 }
  0x9f   :  { %902 = vmatpush.bf16.msrb.mxu2 %v2388_v35 }
  0xa0   :  { %921 = vmatpush.bf16.msra.mxu0 %v2390_v50  ;;  %889 = vmatpush.bf16.msrb.mxu1 %v2393_v54 }
  0xa1   :  { %915 = vmatpush.bf16.msrb.mxu3 %v2396_v49 }
  0xa4   :  { %922 = vmatpush.bf16.msra.mxu0 %v2401_v6 }
  0xa8   :  { %923 = vmatpush.bf16.msra.mxu0 %v2411_v24 }
  0xac   :  { %924 = vmatpush.bf16.msra.mxu0 %v2418_v22 }
  0xb0   :  { %925 = vmatpush.bf16.msra.mxu0 %v2424_v60  ;;  %v723_v60 = vld [vmem:[%s2633_s5] sm:$0xf] }
  0xb4   :  { %926 = vmatpush.bf16.msra.mxu0 %v2430_v12  ;;  %v2496_v12 = vperm.slane %v723_v60, 0 }
  0xb6   :  { %2714 = vst [vmem:[#allocation31_spill] sm:$0xff] %v2496_v12 }
  0xb8   :  { %927 = vmatpush.bf16.msra.mxu0 %v2436_v34  ;;  %v2498_v34 = vperm.slane %v723_v60, 1 }
  0xba   :  { %2715 = vst [vmem:[#allocation48_spill] sm:$0xff] %v2498_v34 }
  0xbc   :  { %928 = vmatpush.bf16.msra.mxu0 %v2442_v63 }
  0xbe   :  { %v226_v29 = vpop.f32.mrf.mxu0 }
  0xbf   :  { %v468_v44 = vpop.f32.mrf.mxu1 }
  0xc5   :  { %v481_v35 = vpop.f32.mrf.mxu2 }
  0xc6   :  { %v228_v49 = vpop.f32.mrf.mxu0 }
  0xc7   :  { %v470_v5 = vpop.f32.mrf.mxu1 }
  0xc8   :  { %v494_v54 = vpop.f32.mrf.mxu3 }
  0xcd   :  { %v483_v1 = vpop.f32.mrf.mxu2 }
  0xd0   :  { %v496_v21 = vpop.f32.mrf.mxu3 }
  0xde   :  { %v507_v18 = vpop.f32.mrf.mxu0 }
  0xdf   :  { %v680_v14 = vpop.f32.mrf.mxu1 }
  0xe0   :  { %v681_v10 = vadd.f32 %v680_v14, %v468_v44  ;;  %v2502_v14 = vperm.slane %v723_v60, 2 }
  0xe2   :  { %v733_v22 = vadd.f32 %v2496_v12, %v681_v10  ;;  %2716 = vst [vmem:[#allocation49_spill] sm:$0xff] %v2502_v14  ;;  %v2505_v12 = vperm.slane %v723_v60, 3 }
  0xe4   :  { %v737_v30 = vmul.f32 0.5, %v733_v22  ;;  %2717 = vst [vmem:[#allocation50_spill] sm:$0xff] %v2505_v12 }
  0xe5   :  { %v693_v63 = vpop.f32.mrf.mxu2 }
  0xe6   :  { %v694_v59 = vadd.f32 %v693_v63, %v481_v35  ;;  %v509_v0 = vpop.f32.mrf.mxu0 }
  0xe7   :  { %v706_v5 = vpop.f32.mrf.mxu3  ;;  %v682_v21 = vpop.f32.mrf.mxu1 }
  0xe8   :  { %v734_v1 = vadd.f32 %v2498_v34, %v694_v59  ;;  %v707_v24 = vadd.f32 %v706_v5, %v494_v54 }
  0xea   :  { %v741_v45 = vmul.f32 0.5, %v734_v1  ;;  %v735_v8 = vadd.f32 %v2502_v14, %v707_v24  ;;  %v1869_v24 = vld [vmem:[#allocation8] ss:$0 sm:$0xff] }
  0xec   :  { %1871 = vtanh.f32 %v741_v45 }
  0xed   :  { %v695_v40 = vpop.f32.mrf.mxu2  ;;  %1873 = vtanh.f32 %v737_v30 }
  0xee   :  { %1875 = vtanh.f32 %v735_v8  ;;  %v227_v8 = vadd.f32 %v1869_v24, %v226_v29 }
  0xef   :  { %v708_v44 = vpop.f32.mrf.mxu3 }
  0xf2   :  { %v1872_v19 = vpop.eup %1871 }
  0xf3   :  { %v1874_v35 = vpop.eup %1873  ;;  %v743_v0 = vadd.f32 1.0, %v1872_v19  ;;  %v229_v19 = vadd.f32 %v1869_v24, %v228_v49 }
  0xf4   :  { %v739_v63 = vadd.f32 1.0, %v1874_v35  ;;  %v1876_v45 = vpop.eup %1875 }
  0xf5   :  { %v744_v10 = vmul.f32 0.5, %v743_v0  ;;  %v1850_v0 = vpack.c.bf16 %v229_v19, %v227_v8 }
  0xf6   :  { %v740_v1 = vmul.f32 0.5, %v739_v63 }
  0xf7   :  { %v750_v40 = vmul.f32 0.0, %v744_v10  ;;  %v2513_v10 = vunpack.c.l.bf16 %v1850_v0 }
  0xf8   :  { %v751_v54 = vmul.f32 %v1876_v45, %v740_v1 }
  0xfa   :  { %v2508_v21 = vadd.f32 %v751_v54, %v750_v40 }
  0xfc   :  { %v719_v59 = vpop.f32.mrf.mxu0  ;;  %2718 = vst [vmem:[#allocation51_spill] sm:$0xff] %v2508_v21 }
  0xfd   :  { %v720_v22 = vadd.f32 %v719_v59, %v507_v18 }
  0xff   :  { %v736_v30 = vadd.f32 %v2505_v12, %v720_v22 }
 0x101   :  { %v746_v5 = vmul.f32 0.5, %v736_v30  ;;  %v2518_v30 = vunpack.c.h.bf16 %v1850_v0 }
 0x103   :  { %1877 = vtanh.f32 %v746_v5 }
 0x104   :  { %v721_v44 = vpop.f32.mrf.mxu0  ;;  %1879 = vtanh.f32 %v2508_v21 }
 0x109   :  { %v1878_v60 = vpop.eup %1877 }
 0x10a   :  { %v748_v35 = vadd.f32 1.0, %v1878_v60  ;;  %v1880_v18 = vpop.eup %1879 }
 0x10c   :  { %v749_v63 = vmul.f32 0.5, %v748_v35 }
 0x10e   :  { %v2511_v59 = vmul.f32 %v1880_v18, %v749_v63 }
 0x110   :  { %v761_v1 = vperm.slane %v2511_v59, 0  ;;  %v760_v45 = vrot.slane %v2511_v59, 1 }
 0x112   :  { %v765_v22 = vmul.f32 %v2513_v10, %v761_v1  ;;  %v762_v40 = vperm.slane %v760_v45, 0 }
 0x114   :  { %767 = vadd.xlane.f32.xlu0 %v765_v22  ;;  %v766_v49 = vmul.f32 %v2518_v30, %v762_v40 }
 0x11c   :  { %769 = vadd.xlane.f32.xlu0 %v766_v49 }
 0x187   :  { %v768_v29 = vpop.xlane.xlu0 %767 }
 0x188   :  { %v771_v54 = vrot.slane %v768_v29, 4 }
 0x18a   :  { %v772_v5 = vmax.f32 %v768_v29, %v771_v54 }
 0x18c   :  { %v773_v24 = vrot.slane %v772_v5, 2 }
 0x18e   :  { %v774_v44 = vmax.f32 %v772_v5, %v773_v24 }
 0x18f   :  { %v770_v8 = vpop.xlane.xlu0 %769 }
 0x190   :  { %v775_v19 = vrot.slane %v774_v44, 1  ;;  %v777_v60 = vrot.slane %v770_v8, 4 }
 0x192   :  { %v776_v35 = vmax.f32 %v774_v44, %v775_v19  ;;  %v778_v63 = vmax.f32 %v770_v8, %v777_v60 }
 0x194   :  { %v783_v18 = vsub.f32 %v768_v29, %v776_v35  ;;  %v779_v1 = vrot.slane %v778_v63, 2 }
 0x196   :  { %v785_v21 = vmul.f32 1.442695, %v783_v18  ;;  %v780_v22 = vmax.f32 %v778_v63, %v779_v1 }
 0x198   :  { %1881 = vpow2.f32 %v785_v21  ;;  %v781_v0 = vrot.slane %v780_v22, 1 }
 0x19a   :  { %v782_v45 = vmax.f32 %v780_v22, %v781_v0 }
 0x19c   :  { %v784_v12 = vsub.f32 %v770_v8, %v782_v45 }
 0x19e   :  { %v1882_v40 = vpop.eup %1881  ;;  %v787_v49 = vmul.f32 1.442695, %v784_v12 }
 0x19f   :  { %v789_v14 = vrot.slane %v1882_v40, 4 }
 0x1a0   :  { %1883 = vpow2.f32 %v787_v49 }
 0x1a1   :  { %v790_v54 = vadd.f32 %v1882_v40, %v789_v14 }
 0x1a3   :  { %v791_v34 = vrot.slane %v790_v54, 2 }
 0x1a5   :  { %v792_v5 = vadd.f32 %v791_v34, %v790_v54 }
 0x1a6   :  { %v1884_v24 = vpop.eup %1883 }
 0x1a7   :  { %v793_v13 = vrot.slane %v792_v5, 1  ;;  %v795_v6 = vrot.slane %v1884_v24, 4 }
 0x1a9   :  { %v794_v44 = vadd.f32 %v793_v13, %v792_v5  ;;  %v796_v19 = vadd.f32 %v1884_v24, %v795_v6 }
 0x1ab   :  { %1885 = vrcp.f32 %v794_v44  ;;  %v797_v29 = vrot.slane %v796_v19, 2 }
 0x1ad   :  { %v798_v60 = vadd.f32 %v797_v29, %v796_v19 }
 0x1af   :  { %v799_v35 = vrot.slane %v798_v60, 1 }
 0x1b1   :  { %v1886_v21 = vpop.eup %1885  ;;  %v800_v63 = vadd.f32 %v799_v35, %v798_v60 }
 0x1b2   :  { %v803_v18 = vmul.f32 %v1886_v21, %v1882_v40 }
 0x1b3   :  { %1887 = vrcp.f32 %v800_v63 }
 0x1b4   :  { %v805_v12 = vmul.f32 %v2513_v10, %v803_v18 }
 0x1b6   :  { %v807_v8 = vrot.slane %v805_v12, 4 }
 0x1b8   :  { %v808_v1 = vadd.f32 %v807_v8, %v805_v12 }
 0x1b9   :  { %v1888_v14 = vpop.eup %1887 }
 0x1ba   :  { %v804_v22 = vmul.f32 %v1888_v14, %v1884_v24  ;;  %v809_v34 = vrot.slane %v808_v1, 2 }
 0x1bc   :  { %v806_v0 = vmul.f32 %v2518_v30, %v804_v22  ;;  %v810_v45 = vadd.f32 %v809_v34, %v808_v1 }
 0x1be   :  { %v813_v13 = vrot.slane %v806_v0, 4  ;;  %v811_v6 = vrot.slane %v810_v45, 1 }
 0x1c0   :  { %v814_v49 = vadd.f32 %v813_v13, %v806_v0  ;;  %v812_v5 = vadd.f32 %v811_v6, %v810_v45  ;;  %v2746_v45 = vld [vmem:[#allocation48_spill] sm:$0xff] }
 0x1c2   :  { %v815_v54 = vrot.slane %v814_v49, 2  ;;  %v820_v40 = vpack.c.bf16 %v812_v5, %v812_v5 }
 0x1c4   :  { %v816_v44 = vadd.f32 %v815_v54, %v814_v49  ;;  %v824_v35 = vunpack.c.l.b16 %v820_v40  ;;  %v2747_v54 = vld [vmem:[#allocation49_spill] sm:$0xff] }
 0x1c6   :  { %v817_v19 = vrot.slane %v816_v44, 1 }
 0x1c8   :  { %v818_v29 = vadd.f32 %v817_v19, %v816_v44  ;;  %v2748_v44 = vld [vmem:[#allocation50_spill] sm:$0xff] }
 0x1ca   :  { %v821_v60 = vpack.c.bf16 %v818_v29, %v818_v29 }
 0x1cc   :  { %v825_v21 = vunpack.c.l.b16 %v821_v60 }
 0x1ce   :  { %v827_v63 = vsel %vm826_vm0, %v825_v21, %v824_v35 }
 0x1cf   :  { %v828_v24 = vpack.c.b16 %v827_v63, %v827_v63 }
 0x1d1   :  { %838 = vmatmul.bf16.vlgmr.msra.gmra.mxu1 %v828_v24  ;;  %851 = vmatmul.bf16.vlgmr.msra.gmra.mxu2 %v828_v24 }
 0x1d2   :  { %864 = vmatmul.bf16.vlgmr.msra.gmra.mxu3 %v828_v24  ;;  %877 = vmatmul.bf16.vlgmr.msrb.gmra.mxu0 %v828_v24 }
 0x1d3   :  { %1026 = vmatpush.bf16.msra.mxu1 %v2231_v7  ;;  %1039 = vmatpush.bf16.msra.mxu2 %v2229_v3  ;;  %v819_v3 = vpack.c.bf16 %v2511_v59, %v2511_v59  ;;  %v2719_v7 = vld [vmem:[#allocation21_spill] sm:$0xff]  ;;  %v2745_v59 = vld [vmem:[#allocation31_spill] sm:$0xff] }
 0x1d4   :  { %1052 = vmatpush.bf16.msra.mxu3 %v2234_v11  ;;  %1065 = vmatpush.bf16.msrb.mxu0 %v2292_v26  ;;  %v2720_v11 = vld [vmem:[#allocation41_spill] sm:$0xff] }
 0x1d5   :  { %v2739_v26 = vld [vmem:[#allocation37_spill] sm:$0xff] }
 0x1d7   :  { %1027 = vmatpush.bf16.msra.mxu1 %v2239_v16  ;;  %1040 = vmatpush.bf16.msra.mxu2 %v2237_v15  ;;  %v2721_v15 = vld [vmem:[#allocation23_spill] sm:$0xff]  ;;  %v2722_v16 = vld [vmem:[#allocation22_spill] sm:$0xff] }
 0x1d8   :  { %1053 = vmatpush.bf16.msra.mxu3 %v2242_v20  ;;  %1066 = vmatpush.bf16.msrb.mxu0 %v2308_v46  ;;  %v2723_v20 = vld [vmem:[#allocation24_spill] sm:$0xff] }
 0x1db   :  { %1028 = vmatpush.bf16.msra.mxu1 %v2248_v28  ;;  %1041 = vmatpush.bf16.msra.mxu2 %v2245_v27  ;;  %v2724_v27 = vld [vmem:[#allocation42_spill] sm:$0xff] }
 0x1dc   :  { %1054 = vmatpush.bf16.msra.mxu3 %v2251_v31  ;;  %1067 = vmatpush.bf16.msrb.mxu0 %v2323_v2  ;;  %v2725_v28 = vld [vmem:[#allocation26_spill] sm:$0xff]  ;;  %v2726_v31 = vld [vmem:[#allocation25_spill] sm:$0xff] }
 0x1df   :  { %1029 = vmatpush.bf16.msra.mxu1 %v2257_v38  ;;  %1042 = vmatpush.bf16.msra.mxu2 %v2719_v7  ;;  %v2727_v38 = vld [vmem:[#allocation27_spill] sm:$0xff] }
 0x1e0   :  { %1055 = vmatpush.bf16.msra.mxu3 %v2260_v41  ;;  %1068 = vmatpush.bf16.msrb.mxu0 %v2337_v23  ;;  %v2728_v41 = vld [vmem:[#allocation43_spill] sm:$0xff] }
 0x1e1   :  { %890 = vmatmul.bf16.vlgmr.msrb.gmra.mxu1 %v819_v3  ;;  %903 = vmatmul.bf16.vlgmr.msrb.gmra.mxu2 %v819_v3 }
 0x1e2   :  { %916 = vmatmul.bf16.vlgmr.msrb.gmra.mxu3 %v819_v3  ;;  %929 = vmatmul.bf16.vlgmr.msra.gmra.mxu0 %v819_v3 }
 0x1e3   :  { %1030 = vmatpush.bf16.msra.mxu1 %v2266_v48  ;;  %1043 = vmatpush.bf16.msra.mxu2 %v2263_v47  ;;  %v2729_v47 = vld [vmem:[#allocation29_spill] sm:$0xff]  ;;  %v2730_v48 = vld [vmem:[#allocation28_spill] sm:$0xff] }
 0x1e4   :  { %1056 = vmatpush.bf16.msra.mxu3 %v2269_v51  ;;  %1069 = vmatpush.bf16.msrb.mxu0 %v2349_v53  ;;  %v2731_v51 = vld [vmem:[#allocation30_spill] sm:$0xff] }
 0x1e7   :  { %1031 = vmatpush.bf16.msra.mxu1 %v2275_v58  ;;  %1044 = vmatpush.bf16.msra.mxu2 %v2272_v57  ;;  %v2732_v57 = vld [vmem:[#allocation44_spill] sm:$0xff]  ;;  %v2733_v58 = vld [vmem:[#allocation33_spill] sm:$0xff] }
 0x1e8   :  { %1057 = vmatpush.bf16.msra.mxu3 %v2278_v61  ;;  %1070 = vmatpush.bf16.msrb.mxu0 %v2709_v37  ;;  %v2734_v61 = vld [vmem:[#allocation32_spill] sm:$0xff] }
 0x1eb   :  { %1032 = vmatpush.bf16.msra.mxu1 %v2284_v9  ;;  %1045 = vmatpush.bf16.msra.mxu2 %v2281_v4  ;;  %v2735_v4 = vld [vmem:[#allocation34_spill] sm:$0xff]  ;;  %v2736_v9 = vld [vmem:[#allocation45_spill] sm:$0xff] }
 0x1ec   :  { %1058 = vmatpush.bf16.msra.mxu3 %v2287_v17  ;;  %1071 = vmatpush.bf16.msrb.mxu0 %v2373_v56  ;;  %v2737_v17 = vld [vmem:[#allocation36_spill] sm:$0xff] }
 0x1ef   :  { %1033 = vmatpush.bf16.msra.mxu1 %v2297_v33  ;;  %1046 = vmatpush.bf16.msra.mxu2 %v2290_v25  ;;  %v2738_v25 = vld [vmem:[#allocation35_spill] sm:$0xff] }
 0x1f0   :  { %1059 = vmatpush.bf16.msra.mxu3 %v2300_v36  ;;  %1072 = vmatpush.bf16.msrb.mxu0 %v2385_v42  ;;  %v2741_v33 = vld [vmem:[#allocation39_spill] sm:$0xff]  ;;  %v2742_v36 = vld [vmem:[#allocation38_spill] sm:$0xff] }
 0x1f3   :  { %1078 = vmatpush.bf16.msrb.mxu1 %v2302_v39  ;;  %1091 = vmatpush.bf16.msrb.mxu2 %v2295_v32  ;;  %v2740_v32 = vld [vmem:[#allocation46_spill] sm:$0xff]  ;;  %v2743_v39 = vld [vmem:[#allocation40_spill] sm:$0xff] }
 0x1f4   :  { %1104 = vmatpush.bf16.msrb.mxu3 %v2304_v43  ;;  %1117 = vmatpush.bf16.msra.mxu0 %v2390_v50  ;;  %v2744_v43 = vld [vmem:[#allocation47_spill] sm:$0xff] }
 0x1f7   :  { %1079 = vmatpush.bf16.msrb.mxu1 %v2316_v55  ;;  %1092 = vmatpush.bf16.msrb.mxu2 %v2312_v52 }
 0x1f8   :  { %1105 = vmatpush.bf16.msrb.mxu3 %v2319_v62  ;;  %1118 = vmatpush.bf16.msra.mxu0 %v2720_v11 }
 0x1fb   :  { %1080 = vmatpush.bf16.msrb.mxu1 %v2721_v15  ;;  %1093 = vmatpush.bf16.msrb.mxu2 %v2722_v16  ;;  %v2749_v15 = vld [vmem:[#allocation51_spill] sm:$0xff] }
 0x1fc   :  { %1106 = vmatpush.bf16.msrb.mxu3 %v2723_v20  ;;  %1119 = vmatpush.bf16.msra.mxu0 %v2724_v27 }
 0x1ff   :  { %1081 = vmatpush.bf16.msrb.mxu1 %v2725_v28  ;;  %1094 = vmatpush.bf16.msrb.mxu2 %v2726_v31 }
 0x200   :  { %1107 = vmatpush.bf16.msrb.mxu3 %v2727_v38  ;;  %1120 = vmatpush.bf16.msra.mxu0 %v2728_v41 }
 0x203   :  { %1082 = vmatpush.bf16.msrb.mxu1 %v2729_v47  ;;  %1095 = vmatpush.bf16.msrb.mxu2 %v2730_v48 }
 0x204   :  { %1108 = vmatpush.bf16.msrb.mxu3 %v2731_v51  ;;  %1121 = vmatpush.bf16.msra.mxu0 %v2732_v57 }
 0x207   :  { %1083 = vmatpush.bf16.msrb.mxu1 %v2733_v58  ;;  %1096 = vmatpush.bf16.msrb.mxu2 %v2734_v61 }
 0x208   :  { %1109 = vmatpush.bf16.msrb.mxu3 %v2735_v4  ;;  %1122 = vmatpush.bf16.msra.mxu0 %v2736_v9 }
 0x20b   :  { %1084 = vmatpush.bf16.msrb.mxu1 %v2737_v17  ;;  %1097 = vmatpush.bf16.msrb.mxu2 %v2738_v25 }
 0x20c   :  { %1110 = vmatpush.bf16.msrb.mxu3 %v2739_v26  ;;  %1123 = vmatpush.bf16.msra.mxu0 %v2740_v32 }
 0x20f   :  { %1085 = vmatpush.bf16.msrb.mxu1 %v2741_v33  ;;  %1098 = vmatpush.bf16.msrb.mxu2 %v2742_v36 }
 0x210   :  { %1111 = vmatpush.bf16.msrb.mxu3 %v2743_v39  ;;  %1124 = vmatpush.bf16.msra.mxu0 %v2744_v43 }
 0x24e   :  { %v839_v46 = vpop.f32.mrf.mxu1 }
 0x24f   :  { %v878_v52 = vpop.f32.mrf.mxu0 }
 0x254   :  { %v852_v55 = vpop.f32.mrf.mxu2 }
 0x255   :  { %v865_v62 = vpop.f32.mrf.mxu3 }
 0x256   :  { %v841_v2 = vpop.f32.mrf.mxu1 }
 0x257   :  { %v880_v23 = vpop.f32.mrf.mxu0 }
 0x25c   :  { %v854_v53 = vpop.f32.mrf.mxu2 }
 0x25d   :  { %v867_v56 = vpop.f32.mrf.mxu3 }
 0x25e   :  { %v891_v42 = vpop.f32.mrf.mxu1 }
 0x25f   :  { %v892_v50 = vadd.f32 %v891_v42, %v839_v46  ;;  %v930_v37 = vpop.f32.mrf.mxu0 }
 0x260   :  { %v931_v22 = vadd.f32 %v930_v37, %v878_v52 }
 0x261   :  { %v934_v18 = vadd.f32 %v892_v50, %v2745_v59 }
 0x262   :  { %v937_v19 = vadd.f32 %v931_v22, %v2748_v44 }
 0x263   :  { %v938_v12 = vmul.f32 0.5, %v934_v18 }
 0x264   :  { %v904_v8 = vpop.f32.mrf.mxu2  ;;  %v947_v21 = vmul.f32 0.5, %v937_v19 }
 0x265   :  { %1889 = vtanh.f32 %v938_v12  ;;  %v905_v1 = vadd.f32 %v904_v8, %v852_v55  ;;  %v917_v14 = vpop.f32.mrf.mxu3 }
 0x266   :  { %v918_v34 = vadd.f32 %v917_v14, %v865_v62  ;;  %v893_v0 = vpop.f32.mrf.mxu1 }
 0x267   :  { %v935_v13 = vadd.f32 %v905_v1, %v2746_v45  ;;  %v932_v6 = vpop.f32.mrf.mxu0 }
 0x268   :  { %v936_v5 = vadd.f32 %v918_v34, %v2747_v54 }
 0x269   :  { %v942_v49 = vmul.f32 0.5, %v935_v13 }
 0x26b   :  { %v1890_v29 = vpop.eup %1889  ;;  %1891 = vtanh.f32 %v942_v49 }
 0x26c   :  { %v906_v40 = vpop.f32.mrf.mxu2  ;;  %1893 = vtanh.f32 %v936_v5  ;;  %v940_v35 = vadd.f32 1.0, %v1890_v29 }
 0x26d   :  { %v919_v60 = vpop.f32.mrf.mxu3  ;;  %1895 = vtanh.f32 %v947_v21 }
 0x26e   :  { %v941_v24 = vmul.f32 0.5, %v940_v35 }
 0x271   :  { %v1892_v63 = vpop.eup %1891 }
 0x272   :  { %v944_v3 = vadd.f32 1.0, %v1892_v63  ;;  %v1894_v7 = vpop.eup %1893 }
 0x273   :  { %v952_v20 = vmul.f32 %v1894_v7, %v941_v24  ;;  %v1896_v27 = vpop.eup %1895 }
 0x274   :  { %v945_v11 = vmul.f32 0.5, %v944_v3  ;;  %v949_v31 = vadd.f32 1.0, %v1896_v27 }
 0x276   :  { %v951_v16 = vmul.f32 %v945_v11, %v2749_v15  ;;  %v950_v38 = vmul.f32 0.5, %v949_v31 }
 0x278   :  { %v2595_v28 = vadd.f32 %v952_v20, %v951_v16 }
 0x27a   :  { %1897 = vtanh.f32 %v2595_v28 }
 0x280   :  { %v1898_v41 = vpop.eup %1897 }
 0x281   :  { %v2598_v47 = vmul.f32 %v1898_v41, %v950_v38 }
 0x283   :  { %v958_v48 = vperm.slane %v2598_v47, 0  ;;  %v957_v57 = vrot.slane %v2598_v47, 1 }
 0x285   :  { %v962_v51 = vmul.f32 %v2513_v10, %v958_v48  ;;  %v959_v58 = vperm.slane %v957_v57, 0 }
 0x287   :  { %964 = vadd.xlane.f32.xlu1 %v962_v51  ;;  %v963_v61 = vmul.f32 %v2518_v30, %v959_v58 }
 0x28f   :  { %966 = vadd.xlane.f32.xlu1 %v963_v61 }
 0x2fa   :  { %v965_v4 = vpop.xlane.xlu1 %964 }
 0x2fb   :  { %v968_v9 = vrot.slane %v965_v4, 4 }
 0x2fd   :  { %v969_v17 = vmax.f32 %v965_v4, %v968_v9  ;;  %v1838_v9 = vld [vmem:[#allocation12 + $0x38] sm:$0xff] }
 0x2ff   :  { %v970_v25 = vrot.slane %v969_v17, 2 }
 0x301   :  { %v971_v26 = vmax.f32 %v969_v17, %v970_v25  ;;  %v1837_v17 = vld [vmem:[#allocation12 + $0x30] sm:$0xff] }
 0x302   :  { %v967_v32 = vpop.xlane.xlu1 %966 }
 0x303   :  { %v972_v33 = vrot.slane %v971_v26, 1  ;;  %v974_v36 = vrot.slane %v967_v32, 4 }
 0x305   :  { %v973_v39 = vmax.f32 %v971_v26, %v972_v33  ;;  %v975_v43 = vmax.f32 %v967_v32, %v974_v36  ;;  %v1836_v26 = vld [vmem:[#allocation12 + $0x28] sm:$0xff]  ;;  %v1835_v33 = vld [vmem:[#allocation12 + $0x20] sm:$0xff] }
 0x307   :  { %v980_v46 = vsub.f32 %v965_v4, %v973_v39  ;;  %v976_v52 = vrot.slane %v975_v43, 2  ;;  %v1016_v4 = vpack.c.bf16 %v2598_v47, %v2598_v47  ;;  %v1833_v47 = vld [vmem:[#allocation12 + $0x10] sm:$0xff] }
 0x309   :  { %v982_v55 = vmul.f32 1.442695, %v980_v46  ;;  %v977_v62 = vmax.f32 %v975_v43, %v976_v52  ;;  %v1834_v46 = vld [vmem:[#allocation12 + $0x18] sm:$0xff] }
 0x30b   :  { %1899 = vpow2.f32 %v982_v55  ;;  %v978_v2 = vrot.slane %v977_v62, 1 }
 0x30d   :  { %v979_v23 = vmax.f32 %v977_v62, %v978_v2  ;;  %v1832_v62 = vld [vmem:[#allocation12 + $0x8] sm:$0xff] }
 0x30f   :  { %v981_v53 = vsub.f32 %v967_v32, %v979_v23 }
 0x311   :  { %v1900_v56 = vpop.eup %1899  ;;  %v984_v42 = vmul.f32 1.442695, %v981_v53 }
 0x312   :  { %v986_v50 = vrot.slane %v1900_v56, 4 }
 0x313   :  { %1901 = vpow2.f32 %v984_v42  ;;  %v1831_v42 = vld [vmem:[#allocation12] sm:$0xff] }
 0x314   :  { %v987_v37 = vadd.f32 %v1900_v56, %v986_v50 }
 0x316   :  { %v988_v18 = vrot.slane %v987_v37, 2 }
 0x318   :  { %v989_v12 = vadd.f32 %v988_v18, %v987_v37 }
 0x319   :  { %v1902_v8 = vpop.eup %1901 }
 0x31a   :  { %v990_v1 = vrot.slane %v989_v12, 1  ;;  %v992_v14 = vrot.slane %v1902_v8, 4 }
 0x31c   :  { %v991_v22 = vadd.f32 %v990_v1, %v989_v12  ;;  %v993_v34 = vadd.f32 %v1902_v8, %v992_v14 }
 0x31e   :  { %1903 = vrcp.f32 %v991_v22  ;;  %v994_v0 = vrot.slane %v993_v34, 2 }
 0x320   :  { %v995_v13 = vadd.f32 %v994_v0, %v993_v34 }
 0x322   :  { %v996_v6 = vrot.slane %v995_v13, 1 }
 0x324   :  { %v1904_v49 = vpop.eup %1903  ;;  %v997_v5 = vadd.f32 %v996_v6, %v995_v13 }
 0x325   :  { %v1000_v19 = vmul.f32 %v1904_v49, %v1900_v56 }
 0x326   :  { %1905 = vrcp.f32 %v997_v5 }
 0x327   :  { %v1002_v29 = vmul.f32 %v2513_v10, %v1000_v19 }
 0x329   :  { %v1004_v40 = vrot.slane %v1002_v29, 4 }
 0x32b   :  { %v1005_v60 = vadd.f32 %v1004_v40, %v1002_v29 }
 0x32c   :  { %v1906_v35 = vpop.eup %1905 }
 0x32d   :  { %v1001_v21 = vmul.f32 %v1906_v35, %v1902_v8  ;;  %v1006_v63 = vrot.slane %v1005_v60, 2 }
 0x32f   :  { %v1003_v24 = vmul.f32 %v2518_v30, %v1001_v21  ;;  %v1007_v3 = vadd.f32 %v1006_v63, %v1005_v60 }
 0x331   :  { %v1010_v7 = vrot.slane %v1003_v24, 4  ;;  %v1008_v11 = vrot.slane %v1007_v3, 1 }
 0x333   :  { %v1011_v15 = vadd.f32 %v1010_v7, %v1003_v24  ;;  %v1009_v20 = vadd.f32 %v1008_v11, %v1007_v3 }
 0x335   :  { %v1012_v16 = vrot.slane %v1011_v15, 2  ;;  %v1017_v41 = vpack.c.bf16 %v1009_v20, %v1009_v20 }
 0x337   :  { %v1013_v27 = vadd.f32 %v1012_v16, %v1011_v15  ;;  %v1021_v51 = vunpack.c.l.b16 %v1017_v41 }
 0x339   :  { %v1014_v31 = vrot.slane %v1013_v27, 1 }
 0x33b   :  { %v1015_v38 = vadd.f32 %v1014_v31, %v1013_v27 }
 0x33d   :  { %v1018_v48 = vpack.c.bf16 %v1015_v38, %v1015_v38 }
 0x33f   :  { %v1022_v57 = vunpack.c.l.b16 %v1018_v48 }
 0x341   :  { %v1023_v58 = vsel %vm826_vm0, %v1022_v57, %v1021_v51 }
 0x342   :  { %v1024_v61 = vpack.c.b16 %v1023_v58, %v1023_v58 }
 0x344   :  { %1034 = vmatmul.bf16.vlgmr.msra.gmra.mxu1 %v1024_v61  ;;  %1047 = vmatmul.bf16.vlgmr.msra.gmra.mxu2 %v1024_v61 }
 0x345   :  { %1060 = vmatmul.bf16.vlgmr.msra.gmra.mxu3 %v1024_v61  ;;  %1073 = vmatmul.bf16.vlgmr.msrb.gmra.mxu0 %v1024_v61 }
 0x346   :  { %1363 = vmatpush.bf16.msra.mxu2 %v1838_v9 }
 0x34a   :  { %1364 = vmatpush.bf16.msra.mxu2 %v1837_v17 }
 0x34e   :  { %1365 = vmatpush.bf16.msra.mxu2 %v1836_v26 }
 0x352   :  { %1366 = vmatpush.bf16.msra.mxu2 %v1835_v33 }
 0x354   :  { %1086 = vmatmul.bf16.vlgmr.msrb.gmra.mxu1 %v1016_v4  ;;  %1099 = vmatmul.bf16.vlgmr.msrb.gmra.mxu2 %v1016_v4 }
 0x355   :  { %1112 = vmatmul.bf16.vlgmr.msrb.gmra.mxu3 %v1016_v4  ;;  %1125 = vmatmul.bf16.vlgmr.msra.gmra.mxu0 %v1016_v4 }
 0x356   :  { %1367 = vmatpush.bf16.msra.mxu2 %v1834_v46 }
 0x35a   :  { %1368 = vmatpush.bf16.msra.mxu2 %v1833_v47 }
 0x35e   :  { %1369 = vmatpush.bf16.msra.mxu2 %v1832_v62  ;;  %v1844_v62 = vld [vmem:[#allocation14 + $0x28] sm:$0xff] }
 0x362   :  { %1370 = vmatpush.bf16.msra.mxu2 %v1831_v42 }
 0x3c1   :  { %v1035_v25 = vpop.f32.mrf.mxu1 }
 0x3c2   :  { %v1074_v32 = vpop.f32.mrf.mxu0 }
 0x3c7   :  { %v1048_v36 = vpop.f32.mrf.mxu2 }
 0x3c8   :  { %v1061_v39 = vpop.f32.mrf.mxu3 }
 0x3c9   :  { %v1037_v43 = vpop.f32.mrf.mxu1 }
 0x3ca   :  { %v1076_v52 = vpop.f32.mrf.mxu0 }
 0x3cb   :  { %v1845_v52 = vld [vmem:[#allocation14 + $0x30] sm:$0xff] }
 0x3cf   :  { %v1050_v55 = vpop.f32.mrf.mxu2 }
 0x3d0   :  { %v1063_v2 = vpop.f32.mrf.mxu3 }
 0x3d1   :  { %v1087_v23 = vpop.f32.mrf.mxu1 }
 0x3d2   :  { %v1088_v53 = vadd.f32 %v1087_v23, %v1035_v25  ;;  %v1126_v56 = vpop.f32.mrf.mxu0  ;;  %v1843_v23 = vld [vmem:[#allocation14 + $0x20] sm:$0xff] }
 0x3d3   :  { %v1127_v1 = vadd.f32 %v1126_v56, %v1074_v32  ;;  %v1846_v32 = vld [vmem:[#allocation14 + $0x38] sm:$0xff] }
 0x3d4   :  { %v1130_v50 = vadd.f32 %v1088_v53, %v2745_v59  ;;  %1302 = vmatpush.bf16.msra.mxu1 %v1846_v32 }
 0x3d5   :  { %v1133_v49 = vadd.f32 %v1127_v1, %v2748_v44 }
 0x3d6   :  { %v1134_v37 = vmul.f32 0.5, %v1130_v50 }
 0x3d7   :  { %v1100_v18 = vpop.f32.mrf.mxu2  ;;  %v1143_v40 = vmul.f32 0.5, %v1133_v49 }
 0x3d8   :  { %1907 = vtanh.f32 %v1134_v37  ;;  %v1101_v12 = vadd.f32 %v1100_v18, %v1048_v36  ;;  %v1113_v8 = vpop.f32.mrf.mxu3  ;;  %1303 = vmatpush.bf16.msra.mxu1 %v1845_v52  ;;  %v1842_v37 = vld [vmem:[#allocation14 + $0x18] sm:$0xff] }
 0x3d9   :  { %v1114_v14 = vadd.f32 %v1113_v8, %v1061_v39  ;;  %v1089_v22 = vpop.f32.mrf.mxu1  ;;  %v1841_v8 = vld [vmem:[#allocation14 + $0x10] sm:$0xff] }
 0x3da   :  { %v1131_v34 = vadd.f32 %v1101_v12, %v2746_v45  ;;  %v1128_v0 = vpop.f32.mrf.mxu0 }
 0x3db   :  { %v1132_v6 = vadd.f32 %v1114_v14, %v2747_v54  ;;  %v1840_v0 = vld [vmem:[#allocation14 + $0x8] sm:$0xff] }
 0x3dc   :  { %v1138_v13 = vmul.f32 0.5, %v1131_v34  ;;  %1304 = vmatpush.bf16.msra.mxu1 %v1844_v62 }
 0x3de   :  { %v1908_v5 = vpop.eup %1907  ;;  %1909 = vtanh.f32 %v1138_v13 }
 0x3df   :  { %v1102_v59 = vpop.f32.mrf.mxu2  ;;  %1911 = vtanh.f32 %v1132_v6  ;;  %v1136_v29 = vadd.f32 1.0, %v1908_v5  ;;  %v1839_v5 = vld [vmem:[#allocation14] sm:$0xff] }
 0x3e0   :  { %v1115_v19 = vpop.f32.mrf.mxu3  ;;  %1913 = vtanh.f32 %v1143_v40  ;;  %1305 = vmatpush.bf16.msra.mxu1 %v1843_v23 }
 0x3e1   :  { %v1137_v35 = vmul.f32 0.5, %v1136_v29 }
 0x3e4   :  { %v1910_v60 = vpop.eup %1909  ;;  %1306 = vmatpush.bf16.msra.mxu1 %v1842_v37 }
 0x3e5   :  { %v1140_v21 = vadd.f32 1.0, %v1910_v60  ;;  %v1912_v63 = vpop.eup %1911 }
 0x3e6   :  { %v1148_v3 = vmul.f32 %v1912_v63, %v1137_v35  ;;  %v1914_v7 = vpop.eup %1913 }
 0x3e7   :  { %v1141_v24 = vmul.f32 0.5, %v1140_v21  ;;  %v1145_v44 = vadd.f32 1.0, %v1914_v7 }
 0x3e8   :  { %1307 = vmatpush.bf16.msra.mxu1 %v1841_v8 }
 0x3e9   :  { %v1147_v45 = vmul.f32 %v1141_v24, %v2595_v28  ;;  %v1146_v11 = vmul.f32 0.5, %v1145_v44 }
 0x3eb   :  { %v1149_v54 = vadd.f32 %v1148_v3, %v1147_v45 }
 0x3ec   :  { %1308 = vmatpush.bf16.msra.mxu1 %v1840_v0 }
 0x3ed   :  { %1915 = vtanh.f32 %v1149_v54 }
 0x3f0   :  { %1309 = vmatpush.bf16.msra.mxu1 %v1839_v5 }
 0x3f3   :  { %v1916_v15 = vpop.eup %1915 }
 0x3f4   :  { %v1151_v16 = vmul.f32 %v1916_v15, %v1146_v11 }
 0x3f6   :  { %v1212_v20 = vpack.c.bf16 %v1151_v16, %v1151_v16  ;;  %v1154_v27 = vperm.slane %v1151_v16, 0  ;;  %v1153_v38 = vrot.slane %v1151_v16, 1 }
 0x3f8   :  { %1371 = vmatmul.bf16.vlgmr.msra.gmra.mxu2 %v1212_v20  ;;  %v1158_v31 = vmul.f32 %v2513_v10, %v1154_v27  ;;  %v1155_v41 = vperm.slane %v1153_v38, 0 }
 0x3fa   :  { %1160 = vadd.xlane.f32.xlu2 %v1158_v31  ;;  %v1159_v48 = vmul.f32 %v2518_v30, %v1155_v41 }
 0x402   :  { %1162 = vadd.xlane.f32.xlu2 %v1159_v48 }
 0x46d   :  { %v1161_v28 = vpop.xlane.xlu2 %1160 }
 0x46e   :  { %v1164_v51 = vrot.slane %v1161_v28, 4 }
 0x470   :  { %v1165_v57 = vmax.f32 %v1161_v28, %v1164_v51 }
 0x472   :  { %v1166_v58 = vrot.slane %v1165_v57, 2 }
 0x474   :  { %v1167_v61 = vmax.f32 %v1165_v57, %v1166_v58 }
 0x475   :  { %v1163_v4 = vpop.xlane.xlu2 %1162 }
 0x476   :  { %v1168_v9 = vrot.slane %v1167_v61, 1  ;;  %v1170_v17 = vrot.slane %v1163_v4, 4 }
 0x478   :  { %v1169_v25 = vmax.f32 %v1167_v61, %v1168_v9  ;;  %v1171_v26 = vmax.f32 %v1163_v4, %v1170_v17 }
 0x47a   :  { %v1176_v33 = vsub.f32 %v1161_v28, %v1169_v25  ;;  %v1172_v36 = vrot.slane %v1171_v26, 2 }
 0x47b   :  { %v2616_v39 = vpop.f32.mrf.mxu2 }
 0x47c   :  { %v1178_v43 = vmul.f32 1.442695, %v1176_v33  ;;  %v1173_v46 = vmax.f32 %v1171_v26, %v1172_v36 }
 0x47e   :  { %1917 = vpow2.f32 %v1178_v43  ;;  %v1174_v47 = vrot.slane %v1173_v46, 1 }
 0x480   :  { %v1175_v55 = vmax.f32 %v1173_v46, %v1174_v47 }
 0x482   :  { %v1177_v2 = vsub.f32 %v1163_v4, %v1175_v55 }
 0x483   :  { %v1374_v53 = vpop.f32.mrf.mxu2 }
 0x484   :  { %v1918_v56 = vpop.eup %1917  ;;  %v1180_v42 = vmul.f32 1.442695, %v1177_v2 }
 0x485   :  { %v1182_v50 = vrot.slane %v1918_v56, 4 }
 0x486   :  { %1919 = vpow2.f32 %v1180_v42 }
 0x487   :  { %v1183_v18 = vadd.f32 %v1918_v56, %v1182_v50 }
 0x489   :  { %v1184_v12 = vrot.slane %v1183_v18, 2 }
 0x48b   :  { %v1185_v1 = vadd.f32 %v1184_v12, %v1183_v18 }
 0x48c   :  { %v1920_v14 = vpop.eup %1919 }
 0x48d   :  { %v1186_v22 = vrot.slane %v1185_v1, 1  ;;  %v1188_v34 = vrot.slane %v1920_v14, 4 }
 0x48f   :  { %v1187_v13 = vadd.f32 %v1186_v22, %v1185_v1  ;;  %v1189_v6 = vadd.f32 %v1920_v14, %v1188_v34 }
 0x491   :  { %1921 = vrcp.f32 %v1187_v13  ;;  %v1190_v49 = vrot.slane %v1189_v6, 2 }
 0x493   :  { %v1191_v59 = vadd.f32 %v1190_v49, %v1189_v6 }
 0x495   :  { %v1192_v19 = vrot.slane %v1191_v59, 1 }
 0x497   :  { %v1922_v29 = vpop.eup %1921  ;;  %v1193_v40 = vadd.f32 %v1192_v19, %v1191_v59 }
 0x498   :  { %v1196_v60 = vmul.f32 %v1922_v29, %v1918_v56 }
 0x499   :  { %1923 = vrcp.f32 %v1193_v40 }
 0x49a   :  { %v1198_v35 = vmul.f32 %v2513_v10, %v1196_v60 }
 0x49c   :  { %v1200_v21 = vrot.slane %v1198_v35, 4 }
 0x49e   :  { %v1201_v63 = vadd.f32 %v1200_v21, %v1198_v35 }
 0x49f   :  { %v1924_v24 = vpop.eup %1923 }
 0x4a0   :  { %v1197_v45 = vmul.f32 %v1924_v24, %v1920_v14  ;;  %v1202_v3 = vrot.slane %v1201_v63, 2 }
 0x4a2   :  { %v1199_v7 = vmul.f32 %v2518_v30, %v1197_v45  ;;  %v1203_v54 = vadd.f32 %v1202_v3, %v1201_v63  ;;  %v1870_v30 = vld [vmem:[%s2636_s8] ss:$0 sm:$0xff] }
 0x4a4   :  { %v1206_v44 = vrot.slane %v1199_v7, 4  ;;  %v1204_v11 = vrot.slane %v1203_v54, 1 }
 0x4a6   :  { %v1207_v15 = vadd.f32 %v1206_v44, %v1199_v7  ;;  %v1205_v20 = vadd.f32 %v1204_v11, %v1203_v54 }
 0x4a8   :  { %v1208_v16 = vrot.slane %v1207_v15, 2  ;;  %v1229_v41 = vpack.c.bf16 %v1205_v20, %v1205_v20 }
 0x4aa   :  { %v1209_v27 = vadd.f32 %v1208_v16, %v1207_v15  ;;  %v1249_v28 = vunpack.c.l.b16 %v1229_v41 }
 0x4ac   :  { %v1210_v31 = vrot.slane %v1209_v27, 1 }
 0x4ae   :  { %v1211_v38 = vadd.f32 %v1210_v31, %v1209_v27 }
 0x4b0   :  { %v1230_v48 = vpack.c.bf16 %v1211_v38, %v1211_v38 }
 0x4b2   :  { %v1250_v10 = vunpack.c.l.b16 %v1230_v48 }
 0x4b4   :  { %v1251_v51 = vsel %vm826_vm0, %v1250_v10, %v1249_v28 }
 0x4b5   :  { %v1252_v57 = vpack.c.b16 %v1251_v51, %v1251_v51 }
 0x4b7   :  { %1310 = vmatmul.bf16.vlgmr.msra.gmra.mxu1 %v1252_v57 }
 0x534   :  { %v1311_v58 = vpop.f32.mrf.mxu1 }
 0x535   :  { %v1373_v61 = vadd.f32 %v2616_v39, %v1311_v58 }
 0x537   :  { %v1380_v4 = vadd.f32 %v1870_v30, %v1373_v61 }
 0x539   :  { %1381 = vst [vmem:[#allocation15] sm:$0x3] %v1380_v4 }
 0x53a   :  { %1392 = dma.vmem_to_hbm [thread:$0]  %s1388_s21, 32, %s1390_s25, [#allocation5]  }
 0x53c   :  { %v1313_v9 = vpop.f32.mrf.mxu1 }
 0x53d   :  { %2125 = dma.done.wait [#allocation5], 32  }
 0x53e   :  { %2126 = vsyncadd [#allocation5], 4294967264 }
 0x53f   :  { %1397 = vsyncpa [#allocation4], 1 }
 0x540   :  { %1398 = vsyncpa [#allocation7], 1 }
 0x541   :  { %1399 = vsyncpa [#allocation10], 1 }
 0x542   :  { %1400 = vsyncpa [#allocation13], 1 }
 0x543   :  { %1401 = vsyncpa [#allocation5], 1 }

</bundles_post_ra>
